<compile_context>
chip_gen: v7x
topology: tpu7x:2x2x1
jax: 0.10.0
libtpu: 0.0.40
codegen_flags: <defaults>
</compile_context>

<pallas_src>
import jax
import jax.numpy as jnp
from jax.experimental import pallas as pl
from jax.experimental.pallas import tpu as pltpu

C_FEAT = 2048          # resnet50.fc.in_features
SPATIAL = 7            # resnet_h output spatial size (7x7)
P = SPATIAL * SPATIAL  # 49


def image_model_head(hidden_state_pc, params, *, batch_block=32):
    """hidden_state_pc: (N, 49, 2048) channels-last resnet_h feature map
    (positions row-major, matching torch Flatten(start_dim=2)); bfloat16
    recommended — f32 inputs are cast in the wrapper.

    Returns (hidden_trans, trans) = ((N, S, H), (N, H)) in float32 — the
    eval-mode forward of the ImageModel head (Dropout = identity).
    """
    N = hidden_state_pc.shape[0]
    assert hidden_state_pc.shape[1:] == (P, C_FEAT)

    S = params["conv_w"].shape[0]            # config.img_hidden_seq
    H = params["lin_w"].shape[0]             # config.middle_hidden_size
    F = S + H

    # ---- weight prep (torch layouts -> matmul-ready; done once, wrapper-side) ----
    wc = params["conv_w"].reshape(S, C_FEAT).astype(jnp.float32)   # (S, C) from (S,C,1,1)
    wt = params["trans_w"].astype(jnp.float32)                     # (H, C)
    wcomb = jnp.concatenate([wc, wt], axis=0).T.astype(jnp.bfloat16)   # (C, S+H) fused
    wl = params["lin_w"].T.astype(jnp.float32)                     # (P, H)  Linear(49,H)
    # Conv2d bias folded through Linear(49,H):  bl_eff[s,h] = bl[h] + bc[s]*sum_p wl[p,h]
    bias_eff = (params["lin_b"].astype(jnp.float32)[None, :]
                + params["conv_b"].astype(jnp.float32)[:, None]
                * jnp.sum(wl, axis=0)[None, :])                    # (S, H)
    bt = params["trans_b"].astype(jnp.float32)                     # (H,)

    # ---- batch blocking ----
    B_BLK = int(max(1, min(N, batch_block)))
    if B_BLK < N:
        # multi-block: keep the (8,128) row-tiling constraint on B_BLK*49 rows
        B_BLK = max(8, (B_BLK // 8) * 8)
    n_blocks = pl.cdiv(N, B_BLK)
    N_pad = n_blocks * B_BLK

    # features: bf16 + flattened to a lane-dense (N_pad*49, 2048) slab (free view)
    h = hidden_state_pc
    if h.dtype != jnp.bfloat16:
        h = h.astype(jnp.bfloat16)
    if N_pad != N:
        h = jnp.pad(h, ((0, N_pad - N), (0, 0), (0, 0)))
    h2d = h.reshape(N_pad * P, C_FEAT)

    # small resident per-step constants (pre-tiled -> zero in-kernel broadcasts)
    b1_tiled = jnp.tile(bias_eff, (B_BLK, 1))                      # (B_BLK*S, H)
    bt_tiled = jnp.tile(bt[None, :], (B_BLK, 1))                   # (B_BLK, H)
    # block-averaging matrix: pooled = pool @ comb_trans  (avg-pool as one 2-D dot)
    pool = jnp.kron(jnp.eye(B_BLK, dtype=jnp.float32),
                    jnp.full((1, P), 1.0 / P, dtype=jnp.float32))  # (B_BLK, B_BLK*P)

    def kernel(h_ref, wcomb_ref, wl_ref, b1_ref, bt_ref, pool_ref, o1_ref, o2_ref):
        # One fused MXU pass over the whole image block: 1x1-conv + trans proj.
        comb = jnp.dot(h_ref[...], wcomb_ref[...],
                       preferred_element_type=jnp.float32)          # (B*P, S+H) f32

        # ---- trans: AdaptiveAvgPool2d + Linear(2048,H) + ReLU ----
        # mean-after-matmul (exact by linearity), pooling as a single 2-D matmul.
        pooled = jnp.dot(pool_ref[...], comb[:, S:],
                         preferred_element_type=jnp.float32)        # (B, H)
        o2_ref[...] = jnp.maximum(pooled + bt_ref[...], 0.0).astype(o2_ref.dtype)

        # ---- hidden_trans: Conv2d(C,S,1) + Flatten + Linear(49,H) + ReLU ----
        conv = comb[:, :S].reshape(B_BLK, P, S)                     # (B, P, S)
        conv = jnp.swapaxes(conv, 1, 2).reshape(B_BLK * S, P)       # (B*S, P)
        lin = jnp.dot(conv, wl_ref[...],
                      preferred_element_type=jnp.float32)           # (B*S, H)
        o1_ref[...] = jnp.maximum(lin + b1_ref[...], 0.0).astype(o1_ref.dtype)

    out1, out2 = pl.pallas_call(
        kernel,
        out_shape=(jax.ShapeDtypeStruct((N_pad * S, H), jnp.float32),
                   jax.ShapeDtypeStruct((N_pad, H), jnp.float32)),
        grid_spec=pltpu.PrefetchScalarGridSpec(
            num_scalar_prefetch=0,
            grid=(n_blocks,),
            in_specs=[
                pl.BlockSpec((B_BLK * P, C_FEAT), lambda i: (i, 0)),  # features
                pl.BlockSpec((C_FEAT, F), lambda i: (0, 0)),          # fused weight
                pl.BlockSpec((P, H), lambda i: (0, 0)),               # Linear(49,H) w
                pl.BlockSpec((B_BLK * S, H), lambda i: (0, 0)),       # eff. bias (tiled)
                pl.BlockSpec((B_BLK, H), lambda i: (0, 0)),           # trans bias (tiled)
                pl.BlockSpec((B_BLK, B_BLK * P), lambda i: (0, 0)),   # avg-pool matrix
            ],
            out_specs=(
                pl.BlockSpec((B_BLK * S, H), lambda i: (i, 0)),
                pl.BlockSpec((B_BLK, H), lambda i: (i, 0)),
            ),
        ),
        compiler_params=pltpu.CompilerParams(
            dimension_semantics=("parallel",),        # independent batch blocks
            vmem_limit_bytes=48 * 1024 * 1024),
    )(h2d, wcomb, wl, b1_tiled, bt_tiled, pool)

    out1 = out1.reshape(N_pad, S, H)[:N]
    out2 = out2[:N]
    return out1, out2


def _stand_in_resnet_h(imgs, wp, bp):
    # TODO(synk): the real module uses a pretrained torchvision ResNet-50 backbone;
    # its weights cannot be materialized in-script, so a deterministic single-layer
    # patch-projection stand-in producing the same (N, 49, 2048) channels-last
    # feature map (positions row-major, matching Flatten(start_dim=2)) is used.
    # It emits bf16 directly, as a real mixed-precision backbone would.
    N, Cin, Himg, Wimg = imgs.shape
    ph, pw = Himg // SPATIAL, Wimg // SPATIAL
    x = imgs.reshape(N, Cin, SPATIAL, ph, SPATIAL, pw)
    x = x.transpose(0, 2, 4, 1, 3, 5).reshape(N, P, Cin * ph * pw)
    return jax.nn.relu(x @ wp + bp).astype(jnp.bfloat16)   # (N, 49, 2048), lane-dense


if __name__ == "__main__":
    key = jax.random.PRNGKey(0)
    N, Cin, IMG = 2, 3, 56            # small image, downsampled 8x -> 7x7 map
    S, H = 8, 32                      # config.img_hidden_seq, config.middle_hidden_size
    ks = jax.random.split(key, 8)

    imgs = jax.random.normal(ks[0], (N, Cin, IMG, IMG), jnp.float32)

    patch_dim = Cin * (IMG // SPATIAL) ** 2
    wp = jax.random.normal(ks[1], (patch_dim, C_FEAT), jnp.float32) / jnp.sqrt(patch_dim)
    bp = jax.random.normal(ks[2], (C_FEAT,), jnp.float32) * 0.01

    params = {
        # nn.Conv2d(2048, S, 1): weight (S, 2048, 1, 1), bias (S,)
        "conv_w": jax.random.normal(ks[3], (S, C_FEAT, 1, 1), jnp.float32) / jnp.sqrt(C_FEAT),
        "conv_b": jax.random.normal(ks[4], (S,), jnp.float32) * 0.01,
        # nn.Linear(49, H): weight (H, 49), bias (H,)
        "lin_w": jax.random.normal(ks[5], (H, P), jnp.float32) / jnp.sqrt(P),
        "lin_b": jnp.zeros((H,), jnp.float32),
        # nn.Linear(2048, H): weight (H, 2048), bias (H,)
        "trans_w": jax.random.normal(ks[6], (H, C_FEAT), jnp.float32) / jnp.sqrt(C_FEAT),
        "trans_b": jax.random.normal(ks[7], (H,), jnp.float32) * 0.01,
    }

    hidden_pc = _stand_in_resnet_h(imgs, wp, bp)          # (N, 49, 2048) bf16

    out1, out2 = image_model_head(hidden_pc, params)
    out1, out2 = jax.block_until_ready((out1, out2))

    # pure-JAX f32 reference for the head (eval mode: Dropout = identity)
    h_f32 = hidden_pc.astype(jnp.float32)
    hf_cp = h_f32.transpose(0, 2, 1)                      # (N, 2048, 49) == torch flatten
    conv_ref = jnp.einsum("sc,ncp->nsp", params["conv_w"].reshape(S, C_FEAT), hf_cp)
    conv_ref = conv_ref + params["conv_b"][None, :, None]
    ref1 = jax.nn.relu(conv_ref @ params["lin_w"].T + params["lin_b"])
    feat_ref = hf_cp.mean(axis=-1)                        # AdaptiveAvgPool2d(1)+Flatten
    ref2 = jax.nn.relu(feat_ref @ params["trans_w"].T + params["trans_b"])

    assert out1.shape == (N, S, H) and out2.shape == (N, H)
    assert jnp.allclose(out1, ref1, rtol=5e-2, atol=5e-2)
    assert jnp.allclose(out2, ref2, rtol=5e-2, atol=5e-2)
    print("KERNEL_OK")
</pallas_src>

<mosaic_0001>
module attributes {stable_mosaic.version = 11 : i64} {
  func.func @kernel(%arg0: i32, %arg1: memref<98x2048xbf16, #tpu.memory_space<vmem>>, %arg2: memref<2048x40xbf16, #tpu.memory_space<vmem>>, %arg3: memref<49x32xf32, #tpu.memory_space<vmem>>, %arg4: memref<16x32xf32, #tpu.memory_space<vmem>>, %arg5: memref<2x32xf32, #tpu.memory_space<vmem>>, %arg6: memref<2x98xf32, #tpu.memory_space<vmem>>, %arg7: memref<16x32xf32, #tpu.memory_space<vmem>>, %arg8: memref<2x32xf32, #tpu.memory_space<vmem>>) attributes {dimension_semantics = [#tpu.dimension_semantics<parallel>], iteration_bounds = array<i64: 1>, scalar_prefetch = 0 : i64, scratch_operands = 0 : i64, tpu.core_type = #tpu.core_type<tc>, window_params = [{transform_indices = @transform_0, window_bounds = array<i64: 98, 2048>}, {pipeline_mode = #tpu.pipeline_mode<synchronous>, transform_indices = @transform_1, window_bounds = array<i64: 2048, 40>}, {pipeline_mode = #tpu.pipeline_mode<synchronous>, transform_indices = @transform_2, window_bounds = array<i64: 49, 32>}, {pipeline_mode = #tpu.pipeline_mode<synchronous>, transform_indices = @transform_3, window_bounds = array<i64: 16, 32>}, {pipeline_mode = #tpu.pipeline_mode<synchronous>, transform_indices = @transform_4, window_bounds = array<i64: 2, 32>}, {pipeline_mode = #tpu.pipeline_mode<synchronous>, transform_indices = @transform_5, window_bounds = array<i64: 2, 98>}, {transform_indices = @transform_6, window_bounds = array<i64: 16, 32>}, {transform_indices = @transform_7, window_bounds = array<i64: 2, 32>}]} {
    %c0 = arith.constant 0 : index
    %c0_0 = arith.constant 0 : index
    %0 = vector.load %arg1[%c0, %c0_0] : memref<98x2048xbf16, #tpu.memory_space<vmem>>, vector<98x2048xbf16>
    %c0_1 = arith.constant 0 : index
    %c0_2 = arith.constant 0 : index
    %1 = vector.load %arg2[%c0_1, %c0_2] : memref<2048x40xbf16, #tpu.memory_space<vmem>>, vector<2048x40xbf16>
    %cst = arith.constant dense<0.000000e+00> : vector<98x40xf32>
    %2 = tpu.matmul %0, %1, %cst {dimension_numbers = #tpu.dot_dimension_numbers<[1], [0], [0], [1], [0, 0, 1, 1], [], []>} : vector<98x2048xbf16>, vector<2048x40xbf16>, vector<98x40xf32> -> vector<98x40xf32>
    %c0_3 = arith.constant 0 : index
    %c0_4 = arith.constant 0 : index
    %3 = vector.load %arg6[%c0_3, %c0_4] : memref<2x98xf32, #tpu.memory_space<vmem>>, vector<2x98xf32>
    %4 = vector.extract_strided_slice %2 {offsets = [0, 8], sizes = [98, 32], strides = [1, 1]} : vector<98x40xf32> to vector<98x32xf32>
    %cst_5 = arith.constant dense<0.000000e+00> : vector<2x32xf32>
    %5 = tpu.matmul %3, %4, %cst_5 {dimension_numbers = #tpu.dot_dimension_numbers<[1], [0], [0], [1], [0, 0, 1, 1], [], []>} : vector<2x98xf32>, vector<98x32xf32>, vector<2x32xf32> -> vector<2x32xf32>
    %c0_6 = arith.constant 0 : index
    %c0_7 = arith.constant 0 : index
    %6 = vector.load %arg5[%c0_6, %c0_7] : memref<2x32xf32, #tpu.memory_space<vmem>>, vector<2x32xf32>
    %7 = arith.addf %5, %6 : vector<2x32xf32>
    %cst_8 = arith.constant 0.000000e+00 : f32
    %8 = vector.broadcast %cst_8 : f32 to vector<2x32xf32>
    %9 = arith.maximumf %7, %8 : vector<2x32xf32>
    %c0_9 = arith.constant 0 : index
    %c0_10 = arith.constant 0 : index
    %10 = vector.load %arg8[%c0_9, %c0_10] : memref<2x32xf32, #tpu.memory_space<vmem>>, vector<2x32xf32>
    tpu.vector_store %arg8[%c0_9, %c0_10], %9 {strides = array<i32>} : memref<2x32xf32, #tpu.memory_space<vmem>>, vector<2x32xf32>,
    %11 = vector.extract_strided_slice %2 {offsets = [0, 0], sizes = [98, 8], strides = [1, 1]} : vector<98x40xf32> to vector<98x8xf32>
    %12 = vector.shape_cast %11 : vector<98x8xf32> to vector<2x49x8xf32>
    %13 = tpu.transpose %12, [0, 2, 1] : vector<2x49x8xf32> -> vector<2x8x49xf32>
    %14 = vector.shape_cast %13 : vector<2x8x49xf32> to vector<16x49xf32>
    %c0_11 = arith.constant 0 : index
    %c0_12 = arith.constant 0 : index
    %15 = vector.load %arg3[%c0_11, %c0_12] : memref<49x32xf32, #tpu.memory_space<vmem>>, vector<49x32xf32>
    %cst_13 = arith.constant dense<0.000000e+00> : vector<16x32xf32>
    %16 = tpu.matmul %14, %15, %cst_13 {dimension_numbers = #tpu.dot_dimension_numbers<[1], [0], [0], [1], [0, 0, 1, 1], [], []>} : vector<16x49xf32>, vector<49x32xf32>, vector<16x32xf32> -> vector<16x32xf32>
    %c0_14 = arith.constant 0 : index
    %c0_15 = arith.constant 0 : index
    %17 = vector.load %arg4[%c0_14, %c0_15] : memref<16x32xf32, #tpu.memory_space<vmem>>, vector<16x32xf32>
    %18 = arith.addf %16, %17 : vector<16x32xf32>
    %cst_16 = arith.constant 0.000000e+00 : f32
    %19 = vector.broadcast %cst_16 : f32 to vector<16x32xf32>
    %20 = arith.maximumf %18, %19 : vector<16x32xf32>
    %c0_17 = arith.constant 0 : index
    %c0_18 = arith.constant 0 : index
    %21 = vector.load %arg7[%c0_17, %c0_18] : memref<16x32xf32, #tpu.memory_space<vmem>>, vector<16x32xf32>
    tpu.vector_store %arg7[%c0_17, %c0_18], %20 {strides = array<i32>} : memref<16x32xf32, #tpu.memory_space<vmem>>, vector<16x32xf32>,
    return
  }
  func.func @transform_0(%arg0: i32) -> (i32, i32) {
    %c0_i32 = arith.constant 0 : i32
    %c0_i32_0 = arith.constant 0 : i32
    return %arg0, %c0_i32 : i32, i32
  }
  func.func @transform_1(%arg0: i32) -> (i32, i32) {
    %c0_i32 = arith.constant 0 : i32
    %c0_i32_0 = arith.constant 0 : i32
    %c0_i32_1 = arith.constant 0 : i32
    return %c0_i32, %c0_i32_0 : i32, i32
  }
  func.func @transform_2(%arg0: i32) -> (i32, i32) {
    %c0_i32 = arith.constant 0 : i32
    %c0_i32_0 = arith.constant 0 : i32
    %c0_i32_1 = arith.constant 0 : i32
    return %c0_i32, %c0_i32_0 : i32, i32
  }
  func.func @transform_3(%arg0: i32) -> (i32, i32) {
    %c0_i32 = arith.constant 0 : i32
    %c0_i32_0 = arith.constant 0 : i32
    %c0_i32_1 = arith.constant 0 : i32
    return %c0_i32, %c0_i32_0 : i32, i32
  }
  func.func @transform_4(%arg0: i32) -> (i32, i32) {
    %c0_i32 = arith.constant 0 : i32
    %c0_i32_0 = arith.constant 0 : i32
    %c0_i32_1 = arith.constant 0 : i32
    return %c0_i32, %c0_i32_0 : i32, i32
  }
  func.func @transform_5(%arg0: i32) -> (i32, i32) {
    %c0_i32 = arith.constant 0 : i32
    %c0_i32_0 = arith.constant 0 : i32
    %c0_i32_1 = arith.constant 0 : i32
    return %c0_i32, %c0_i32_0 : i32, i32
  }
  func.func @transform_6(%arg0: i32) -> (i32, i32) {
    %c0_i32 = arith.constant 0 : i32
    %c0_i32_0 = arith.constant 0 : i32
    return %arg0, %c0_i32 : i32, i32
  }
  func.func @transform_7(%arg0: i32) -> (i32, i32) {
    %c0_i32 = arith.constant 0 : i32
    %c0_i32_0 = arith.constant 0 : i32
    return %arg0, %c0_i32 : i32, i32
  }
}

</mosaic_0001>

<bundles_post_ra>
// kernel: tpu_custom_call.1
= control target key start
LH: loop header
LB: loop body
LE: loop exit
PB: predicated region body
PF: predicated region fallthrough
CT: control target
= control target key end

     0   :  { %13 = vsyncpa [#allocation3], 0  ;;  %s6409_s0 = inlined_call_operand.vmem [shape: bf16[98,2048], index: 0, kind: input, shape index: {}]   ;;  %s6410_s1 = inlined_call_operand.vmem [shape: bf16[2048,40], index: 1, kind: input, shape index: {}]   ;;  %s6411_s2 = inlined_call_operand.vmem [shape: f32[49,32], index: 2, kind: input, shape index: {}]   ;;  %s6412_s3 = inlined_call_operand.vmem [shape: f32[16,32], index: 3, kind: input, shape index: {}]   ;;  %s6413_s4 = inlined_call_operand.vmem [shape: f32[2,32], index: 4, kind: input, shape index: {}]   ;;  %s6414_s5 = inlined_call_operand.vmem [shape: f32[2,98], index: 5, kind: input, shape index: {}]   ;;  %s6415_s6 = inlined_call_operand.hbm [shape: f32[16,32], index: 6, kind: output, shape index: {0}]   ;;  %s6416_s7 = inlined_call_operand.hbm [shape: f32[2,32], index: 7, kind: output, shape index: {1}]  }
   0x1   :  { %v4822_v0 = vld [vmem:[%s6410_s1 + $0x40] sm:$0xff]   ;;  %v4826_v4 = vld [vmem:[%s6410_s1 + $0x48] sm:$0xff]   ;;  %v4830_v8 = vld [vmem:[%s6410_s1 + $0x50] sm:$0xff]  }
   0x2   :  { %v4823_v1 = vld [vmem:[%s6410_s1 + $0xc0] sm:$0xff]   ;;  %4220 = vmatprep.subr.bf16.mxu0 %v4822_v0  ;;  %v4827_v5 = vld [vmem:[%s6410_s1 + $0xc8] sm:$0xff]   ;;  %v4831_v9 = vld [vmem:[%s6410_s1 + $0xd0] sm:$0xff]  }
   0x3   :  { %v4824_v2 = vld [vmem:[%s6410_s1] sm:$0xff]   ;;  %4278 = vmatprep.subr.bf16.mxu1 %v4823_v1  ;;  %v4828_v6 = vld [vmem:[%s6410_s1 + $0x8] sm:$0xff]   ;;  %v4832_v10 = vld [vmem:[%s6410_s1 + $0x10] sm:$0xff]  }
   0x4   :  { %v4825_v3 = vld [vmem:[%s6410_s1 + $0x80] sm:$0xff]   ;;  %4221 = vmatpush3.bf16.msra.mxu0 %v4824_v2  ;;  %v4829_v7 = vld [vmem:[%s6410_s1 + $0x88] sm:$0xff]   ;;  %v4833_v11 = vld [vmem:[%s6410_s1 + $0x90] sm:$0xff]  }
   0x5   :  { %4279 = vmatpush3.bf16.msra.mxu1 %v4825_v3  ;;  %4222 = vmatprep.subr.bf16.mxu0 %v4826_v4  ;;  %v4834_v12 = vld [vmem:[%s6410_s1 + $0x58] sm:$0xff]   ;;  %v4838_v16 = vld [vmem:[%s6410_s1 + $0x60] sm:$0xff]   ;;  %v4842_v20 = vld [vmem:[%s6410_s1 + $0x68] sm:$0xff]  }
   0x6   :  { %4280 = vmatprep.subr.bf16.mxu1 %v4827_v5  ;;  %v4835_v13 = vld [vmem:[%s6410_s1 + $0xd8] sm:$0xff]   ;;  %v4839_v17 = vld [vmem:[%s6410_s1 + $0xe0] sm:$0xff]   ;;  %v4843_v21 = vld [vmem:[%s6410_s1 + $0xe8] sm:$0xff]  }
   0x7   :  { %v4836_v14 = vld [vmem:[%s6410_s1 + $0x18] sm:$0xff]   ;;  %v4840_v18 = vld [vmem:[%s6410_s1 + $0x20] sm:$0xff]   ;;  %v4844_v22 = vld [vmem:[%s6410_s1 + $0x28] sm:$0xff]  }
   0x8   :  { %4223 = vmatpush3.bf16.msra.mxu0 %v4828_v6  ;;  %v4837_v15 = vld [vmem:[%s6410_s1 + $0x98] sm:$0xff]   ;;  %v4841_v19 = vld [vmem:[%s6410_s1 + $0xa0] sm:$0xff]   ;;  %v4845_v23 = vld [vmem:[%s6410_s1 + $0xa8] sm:$0xff]  }
   0x9   :  { %4281 = vmatpush3.bf16.msra.mxu1 %v4829_v7  ;;  %4224 = vmatprep.subr.bf16.mxu0 %v4830_v8  ;;  %v4846_v24 = vld [vmem:[%s6410_s1 + $0x70] sm:$0xff]   ;;  %v4850_v28 = vld [vmem:[%s6410_s1 + $0x78] sm:$0xff]   ;;  %v28_v32 = vld [vmem:[%s6409_s0] sm:$0xff] }
   0xa   :  { %4282 = vmatprep.subr.bf16.mxu1 %v4831_v9  ;;  %v4847_v25 = vld [vmem:[%s6410_s1 + $0xf0] sm:$0xff]   ;;  %v4851_v29 = vld [vmem:[%s6410_s1 + $0xf8] sm:$0xff]   ;;  %v36_v33 = vld [vmem:[%s6409_s0 + $0x40] sm:$0xff] }
   0xb   :  { %v4848_v26 = vld [vmem:[%s6410_s1 + $0x30] sm:$0xff]   ;;  %v4852_v30 = vld [vmem:[%s6410_s1 + $0x38] sm:$0xff]   ;;  %v29_v34 = vld [vmem:[%s6409_s0 + $0x8] sm:$0xff]  ;;  %v3963_v35 = vcombine.low %v28_v32, %v36_v33  ;;  %v3964_v36 = vcombine.high %v28_v32, %v36_v33 }
   0xc   :  { %4225 = vmatpush3.bf16.msra.mxu0 %v4832_v10  ;;  %v4849_v27 = vld [vmem:[%s6410_s1 + $0xb0] sm:$0xff]   ;;  %v4853_v31 = vld [vmem:[%s6410_s1 + $0xb8] sm:$0xff]   ;;  %v37_v37 = vld [vmem:[%s6409_s0 + $0x48] sm:$0xff] }
   0xd   :  { %4283 = vmatpush3.bf16.msra.mxu1 %v4833_v11  ;;  %4226 = vmatprep.subr.bf16.mxu0 %v4834_v12  ;;  %v3965_v38 = vcombine.low %v29_v34, %v37_v37  ;;  %v3966_v39 = vcombine.high %v29_v34, %v37_v37  ;;  %v4854_v40 = vld [vmem:[%s6410_s1 + $0x140] sm:$0xff]   ;;  %v45_v47 = vld [vmem:[%s6409_s0 + $0x88] sm:$0xff]  ;;  %v4862_v56 = vld [vmem:[%s6410_s1 + $0x150] sm:$0xff]  }
   0xe   :  { %4284 = vmatprep.subr.bf16.mxu1 %v4835_v13  ;;  %1724 = vmatprep.mubr.bf16.mxu0 %v3964_v36  ;;  %v4855_v41 = vld [vmem:[%s6410_s1 + $0x100] sm:$0xff]   ;;  %v53_v48 = vld [vmem:[%s6409_s0 + $0xc8] sm:$0xff]  ;;  %v4863_v63 = vld [vmem:[%s6410_s1 + $0x110] sm:$0xff]  }
   0xf   :  { %1812 = vmatprep.mubr.bf16.mxu1 %v3966_v39  ;;  %v4856_v42 = vld [vmem:[%s6410_s1 + $0x1c0] sm:$0xff]   ;;  %v3982_v49 = vcombine.high %v45_v47, %v53_v48  ;;  %v4858_v50 = vld [vmem:[%s6410_s1 + $0x148] sm:$0xff]   ;;  %v3981_v53 = vcombine.low %v45_v47, %v53_v48  ;;  %v4864_v0 = vld [vmem:[%s6410_s1 + $0x1d0] sm:$0xff]  }
  0x10   :  { %4227 = vmatpush3.bf16.msra.mxu0 %v4836_v14  ;;  %v4857_v43 = vld [vmem:[%s6410_s1 + $0x180] sm:$0xff]   ;;  %v4859_v52 = vld [vmem:[%s6410_s1 + $0x108] sm:$0xff]   ;;  %v4865_v1 = vld [vmem:[%s6410_s1 + $0x190] sm:$0xff]  }
  0x11   :  { %4285 = vmatpush3.bf16.msra.mxu1 %v4837_v15  ;;  %4228 = vmatprep.subr.bf16.mxu0 %v4838_v16  ;;  %v44_v44 = vld [vmem:[%s6409_s0 + $0x80] sm:$0xff]  ;;  %v4860_v54 = vld [vmem:[%s6410_s1 + $0x1c8] sm:$0xff]   ;;  %v4866_v3 = vld [vmem:[%s6410_s1 + $0x158] sm:$0xff]  }
  0x12   :  { %4286 = vmatprep.subr.bf16.mxu1 %v4839_v17  ;;  %v52_v45 = vld [vmem:[%s6409_s0 + $0xc0] sm:$0xff]  ;;  %v4861_v55 = vld [vmem:[%s6410_s1 + $0x188] sm:$0xff]   ;;  %v4867_v5 = vld [vmem:[%s6410_s1 + $0x118] sm:$0xff]  }
  0x13   :  { %v3980_v46 = vcombine.high %v44_v44, %v52_v45  ;;  %v3979_v51 = vcombine.low %v44_v44, %v52_v45  ;;  %v60_v57 = vld [vmem:[%s6409_s0 + $0x100] sm:$0xff]  ;;  %v61_v59 = vld [vmem:[%s6409_s0 + $0x108] sm:$0xff]  ;;  %v4868_v12 = vld [vmem:[%s6410_s1 + $0x1d8] sm:$0xff]  }
  0x14   :  { %4229 = vmatpush3.bf16.msra.mxu0 %v4840_v18  ;;  %v68_v58 = vld [vmem:[%s6409_s0 + $0x140] sm:$0xff]  ;;  %v69_v60 = vld [vmem:[%s6409_s0 + $0x148] sm:$0xff]  ;;  %v4869_v13 = vld [vmem:[%s6410_s1 + $0x198] sm:$0xff]  }
  0x15   :  { %4287 = vmatpush3.bf16.msra.mxu1 %v4841_v19  ;;  %4230 = vmatprep.subr.bf16.mxu0 %v4842_v20  ;;  %v3996_v61 = vcombine.high %v60_v57, %v68_v58  ;;  %v3998_v62 = vcombine.high %v61_v59, %v69_v60  ;;  %v3995_v2 = vcombine.low %v60_v57, %v68_v58  ;;  %v76_v6 = vld [vmem:[%s6409_s0 + $0x180] sm:$0xff]  ;;  %v77_v8 = vld [vmem:[%s6409_s0 + $0x188] sm:$0xff]  ;;  %v4886_v44 = vld [vmem:[%s6410_s1 + $0x178] sm:$0xff]  }
  0x16   :  { %4288 = vmatprep.subr.bf16.mxu1 %v4843_v21  ;;  %v3997_v4 = vcombine.low %v61_v59, %v69_v60  ;;  %v84_v7 = vld [vmem:[%s6409_s0 + $0x1c0] sm:$0xff]  ;;  %v85_v10 = vld [vmem:[%s6409_s0 + $0x1c8] sm:$0xff]  ;;  %v4887_v45 = vld [vmem:[%s6410_s1 + $0x138] sm:$0xff]  }
  0x17   :  { %v4012_v9 = vcombine.high %v76_v6, %v84_v7  ;;  %v4014_v11 = vcombine.high %v77_v8, %v85_v10  ;;  %v4870_v14 = vld [vmem:[%s6410_s1 + $0x160] sm:$0xff]   ;;  %v4011_v16 = vcombine.low %v76_v6, %v84_v7  ;;  %v4013_v20 = vcombine.low %v77_v8, %v85_v10  ;;  %v109_v32 = vld [vmem:[%s6409_s0 + $0x288] sm:$0xff]  ;;  %v4889_v48 = vld [vmem:[%s6410_s1 + $0x1b8] sm:$0xff]  }
  0x18   :  { %4231 = vmatpush3.bf16.msra.mxu0 %v4844_v22  ;;  %v4871_v15 = vld [vmem:[%s6410_s1 + $0x120] sm:$0xff]   ;;  %v93_v22 = vld [vmem:[%s6409_s0 + $0x208] sm:$0xff]  ;;  %v39_v57 = vld [vmem:[%s6409_s0 + $0x58] sm:$0xff] }
  0x19   :  { %4289 = vmatpush3.bf16.msra.mxu1 %v4845_v23  ;;  %4232 = vmatprep.subr.bf16.mxu0 %v4846_v24  ;;  %v4872_v17 = vld [vmem:[%s6410_s1 + $0x1e0] sm:$0xff]   ;;  %v101_v23 = vld [vmem:[%s6409_s0 + $0x248] sm:$0xff] }
  0x1a   :  { %4290 = vmatprep.subr.bf16.mxu1 %v4847_v25  ;;  %v92_v18 = vld [vmem:[%s6409_s0 + $0x200] sm:$0xff]  ;;  %v4030_v24 = vcombine.high %v93_v22, %v101_v23  ;;  %v117_v33 = vld [vmem:[%s6409_s0 + $0x2c8] sm:$0xff]  ;;  %v4029_v36 = vcombine.low %v93_v22, %v101_v23  ;;  %v4901_v23 = vld [vmem:[%s6410_s1 + $0x290] sm:$0xff]  }
  0x1b   :  { %v100_v19 = vld [vmem:[%s6409_s0 + $0x240] sm:$0xff]  ;;  %v4046_v39 = vcombine.high %v109_v32, %v117_v33  ;;  %v4894_v8 = vld [vmem:[%s6410_s1 + $0x248] sm:$0xff]  }
  0x1c   :  { %4233 = vmatpush3.bf16.msra.mxu0 %v4848_v26  ;;  %v4028_v21 = vcombine.high %v92_v18, %v100_v19  ;;  %v4873_v25 = vld [vmem:[%s6410_s1 + $0x1a0] sm:$0xff]   ;;  %v4874_v26 = vld [vmem:[%s6410_s1 + $0x168] sm:$0xff]   ;;  %v4027_v34 = vcombine.low %v92_v18, %v100_v19 }
  0x1d   :  { %4291 = vmatpush3.bf16.msra.mxu1 %v4849_v27  ;;  %4234 = vmatprep.subr.bf16.mxu0 %v4850_v28  ;;  %v4875_v27 = vld [vmem:[%s6410_s1 + $0x128] sm:$0xff]  }
  0x1e   :  { %4292 = vmatprep.subr.bf16.mxu1 %v4851_v29  ;;  %v4876_v28 = vld [vmem:[%s6410_s1 + $0x1e8] sm:$0xff]  }
  0x1f   :  { %v4877_v29 = vld [vmem:[%s6410_s1 + $0x1a8] sm:$0xff]  }
  0x20   :  { %4235 = vmatpush3.bf16.msra.mxu0 %v4852_v30  ;;  %v108_v30 = vld [vmem:[%s6409_s0 + $0x280] sm:$0xff]  ;;  %v4896_v10 = vld [vmem:[%s6410_s1 + $0x2c8] sm:$0xff]  }
  0x21   :  { %4293 = vmatpush3.bf16.msra.mxu1 %v4853_v31  ;;  %4336 = vmatprep.subr.bf16.mxu0 %v4854_v40  ;;  %v116_v31 = vld [vmem:[%s6409_s0 + $0x2c0] sm:$0xff]  ;;  %v4880_v40 = vld [vmem:[%s6410_s1 + $0x1f0] sm:$0xff]  }
  0x22   :  { %4394 = vmatprep.subr.bf16.mxu1 %v4856_v42  ;;  %v4044_v37 = vcombine.high %v108_v30, %v116_v31  ;;  %v124_v42 = vld [vmem:[%s6409_s0 + $0x300] sm:$0x11]  ;;  %v4043_v47 = vcombine.low %v108_v30, %v116_v31  ;;  %v87_v30 = vld [vmem:[%s6409_s0 + $0x1d8] sm:$0xff] }
  0x23   :  { %1725 = vmatmul.mubr.bf16.vlgmr.msra.gmra.mrb[0].mxu0 %v3963_v35  ;;  %v4878_v35 = vld [vmem:[%s6410_s1 + $0x170] sm:$0xff]   ;;  %v4059_v58 = vcombine.low %v124_v42, %v124_v42  ;;  %v4905_v31 = vld [vmem:[%s6410_s1 + $0x298] sm:$0xff]  }
  0x24   :  { %1813 = vmatmul.mubr.bf16.vlgmr.msra.gmra.mrb[0].mxu1 %v3965_v38  ;;  %4337 = vmatpush3.bf16.msra.mxu0 %v4855_v41  ;;  %v4879_v38 = vld [vmem:[%s6410_s1 + $0x130] sm:$0xff]  }
  0x25   :  { %4395 = vmatpush3.bf16.msra.mxu1 %v4857_v43  ;;  %1732 = vmatprep.mubr.bf16.mxu0 %v3980_v46  ;;  %v4881_v41 = vld [vmem:[%s6410_s1 + $0x1b0] sm:$0xff]   ;;  %v125_v43 = vld [vmem:[%s6409_s0 + $0x308] sm:$0x11]  ;;  %v4888_v46 = vld [vmem:[%s6410_s1 + $0x1f8] sm:$0xff]  }
  0x26   :  { %1820 = vmatprep.mubr.bf16.mxu1 %v3982_v49  ;;  %4338 = vmatprep.subr.bf16.mxu0 %v4858_v50  ;;  %v4045_v49 = vcombine.low %v109_v32, %v117_v33  ;;  %v4060_v50 = vcombine.high %v124_v42, %v124_v42  ;;  %v4061_v59 = vcombine.low %v125_v43, %v125_v43  ;;  %v4906_v32 = vld [vmem:[%s6410_s1 + $0x260] sm:$0xff]   ;;  %v102_v42 = vld [vmem:[%s6409_s0 + $0x250] sm:$0xff] }
  0x27   :  { %4396 = vmatprep.subr.bf16.mxu1 %v4860_v54  ;;  %v30_v54 = vld [vmem:[%s6409_s0 + $0x10] sm:$0xff] }
  0x28   :  { %4339 = vmatpush3.bf16.msra.mxu0 %v4859_v52  ;;  %v4890_v52 = vld [vmem:[%s6410_s1 + $0x240] sm:$0xff]  }
  0x29   :  { %4397 = vmatpush3.bf16.msra.mxu1 %v4861_v55  ;;  %4340 = vmatprep.subr.bf16.mxu0 %v4862_v56  ;;  %v38_v55 = vld [vmem:[%s6409_s0 + $0x50] sm:$0xff]  ;;  %v31_v56 = vld [vmem:[%s6409_s0 + $0x18] sm:$0xff] }
  0x2a   :  { %4398 = vmatprep.subr.bf16.mxu1 %v4864_v0  ;;  %v3968_v60 = vcombine.high %v30_v54, %v38_v55  ;;  %v47_v0 = vld [vmem:[%s6409_s0 + $0x98] sm:$0xff] }
  0x2b   :  { %1733 = vmatmul.mubr.bf16.gmra.mrb[4].mxu0 %v3979_v51  ;;  %v4062_v51 = vcombine.high %v125_v43, %v125_v43  ;;  %v4912_v43 = vld [vmem:[%s6410_s1 + $0x2e8] sm:$0xff]  }
  0x2c   :  { %1821 = vmatmul.mubr.bf16.gmra.mrb[4].mxu1 %v3981_v53  ;;  %1740 = vmatprep.mubr.bf16.mxu0 %v3996_v61  ;;  %v4892_v53 = vld [vmem:[%s6410_s1 + $0x2c0] sm:$0xff]   ;;  %v3970_v61 = vcombine.high %v31_v56, %v39_v57 }
  0x2d   :  { %1828 = vmatprep.mubr.bf16.mxu1 %v3998_v62  ;;  %4341 = vmatpush3.bf16.msra.mxu0 %v4863_v63  ;;  %v46_v62 = vld [vmem:[%s6409_s0 + $0x90] sm:$0xff] }
  0x2e   :  { %4399 = vmatpush3.bf16.msra.mxu1 %v4865_v1  ;;  %4342 = vmatprep.subr.bf16.mxu0 %v4866_v3  ;;  %v54_v63 = vld [vmem:[%s6409_s0 + $0xd0] sm:$0xff]  ;;  %v3967_v1 = vcombine.low %v30_v54, %v38_v55  ;;  %v3969_v3 = vcombine.low %v31_v56, %v39_v57  ;;  %v4922_v56 = vld [vmem:[%s6410_s1 + $0x278] sm:$0xff]  }
  0x2f   :  { %4400 = vmatprep.subr.bf16.mxu1 %v4868_v12  ;;  %v3984_v6 = vcombine.high %v46_v62, %v54_v63  ;;  %v4898_v12 = vld [vmem:[%s6410_s1 + $0x250] sm:$0xff]   ;;  %v3983_v18 = vcombine.low %v46_v62, %v54_v63  ;;  %v119_v62 = vld [vmem:[%s6409_s0 + $0x2d8] sm:$0xff] }
  0x30   :  { %v4915_v54 = vld [vmem:[%s6410_s1 + $0x230] sm:$0xff]   ;;  %v4925_v63 = vld [vmem:[%s6410_s1 + $0x2b8] sm:$0xff]  }
  0x31   :  { %4343 = vmatpush3.bf16.msra.mxu0 %v4867_v5  ;;  %v4893_v5 = vld [vmem:[%s6410_s1 + $0x280] sm:$0xff]   ;;  %v4917_v55 = vld [vmem:[%s6410_s1 + $0x2b0] sm:$0xff]  }
  0x32   :  { %4401 = vmatpush3.bf16.msra.mxu1 %v4869_v13  ;;  %4344 = vmatprep.subr.bf16.mxu0 %v4870_v14  ;;  %v62_v13 = vld [vmem:[%s6409_s0 + $0x110] sm:$0xff] }
  0x33   :  { %1741 = vmatmul.mubr.bf16.gmra.mrb[8].mxu0 %v3995_v2  ;;  %4402 = vmatprep.subr.bf16.mxu1 %v4872_v17  ;;  %v55_v2 = vld [vmem:[%s6409_s0 + $0xd8] sm:$0xff]  ;;  %v70_v14 = vld [vmem:[%s6409_s0 + $0x150] sm:$0xff] }
  0x34   :  { %1829 = vmatmul.mubr.bf16.gmra.mrb[8].mxu1 %v3997_v4  ;;  %1748 = vmatprep.mubr.bf16.mxu0 %v4012_v9  ;;  %v4891_v4 = vld [vmem:[%s6410_s1 + $0x200] sm:$0xff]   ;;  %v3986_v7 = vcombine.high %v47_v0, %v55_v2  ;;  %v4895_v9 = vld [vmem:[%s6410_s1 + $0x208] sm:$0xff]   ;;  %v4900_v17 = vld [vmem:[%s6410_s1 + $0x2d0] sm:$0xff]   ;;  %v3985_v19 = vcombine.low %v47_v0, %v55_v2  ;;  %v3999_v33 = vcombine.low %v62_v13, %v70_v14 }
  0x35   :  { %1836 = vmatprep.mubr.bf16.mxu1 %v4014_v11  ;;  %4345 = vmatpush3.bf16.msra.mxu0 %v4871_v15  ;;  %v4897_v11 = vld [vmem:[%s6410_s1 + $0x288] sm:$0xff]   ;;  %v63_v15 = vld [vmem:[%s6409_s0 + $0x118] sm:$0xff]  ;;  %v110_v57 = vld [vmem:[%s6409_s0 + $0x290] sm:$0xff] }
  0x36   :  { %4403 = vmatpush3.bf16.msra.mxu1 %v4873_v25  ;;  %4346 = vmatprep.subr.bf16.mxu0 %v4874_v26  ;;  %v4903_v25 = vld [vmem:[%s6410_s1 + $0x218] sm:$0xff]   ;;  %v78_v26 = vld [vmem:[%s6409_s0 + $0x190] sm:$0xff]  ;;  %v4926_v0 = vld [vmem:[%s6410_s1 + $0x340] sm:$0xff]  }
  0x37   :  { %4404 = vmatprep.subr.bf16.mxu1 %v4876_v28  ;;  %v86_v28 = vld [vmem:[%s6409_s0 + $0x1d0] sm:$0xff]  ;;  %v4928_v2 = vld [vmem:[%s6410_s1 + $0x3c0] sm:$0xff]  }
  0x39   :  { %4347 = vmatpush3.bf16.msra.mxu0 %v4875_v27  ;;  %v4904_v27 = vld [vmem:[%s6410_s1 + $0x2d8] sm:$0xff]  }
  0x3a   :  { %4405 = vmatpush3.bf16.msra.mxu1 %v4877_v29  ;;  %4348 = vmatprep.subr.bf16.mxu0 %v4878_v35  ;;  %v79_v29 = vld [vmem:[%s6409_s0 + $0x198] sm:$0xff] }
  0x3b   :  { %1749 = vmatmul.mubr.bf16.gmra.mrb[12].mxu0 %v4011_v16  ;;  %4406 = vmatprep.subr.bf16.mxu1 %v4880_v40  ;;  %v71_v16 = vld [vmem:[%s6409_s0 + $0x158] sm:$0xff]  ;;  %v4910_v40 = vld [vmem:[%s6410_s1 + $0x268] sm:$0xff]  }
  0x3c   :  { %1837 = vmatmul.mubr.bf16.gmra.mrb[12].mxu1 %v4013_v20  ;;  %1756 = vmatprep.mubr.bf16.mxu0 %v4028_v21  ;;  %v4000_v20 = vcombine.high %v62_v13, %v70_v14  ;;  %v4899_v21 = vld [vmem:[%s6410_s1 + $0x210] sm:$0xff]   ;;  %v4002_v22 = vcombine.high %v63_v15, %v71_v16  ;;  %v4001_v35 = vcombine.low %v63_v15, %v71_v16  ;;  %v40_v13 = vld [vmem:[%s6409_s0 + $0x60] sm:$0xff]  ;;  %v33_v14 = vld [vmem:[%s6409_s0 + $0x28] sm:$0xff] }
  0x3d   :  { %1844 = vmatprep.mubr.bf16.mxu1 %v4030_v24  ;;  %4349 = vmatpush3.bf16.msra.mxu0 %v4879_v38  ;;  %v4902_v24 = vld [vmem:[%s6410_s1 + $0x258] sm:$0xff]   ;;  %v4018_v38 = vcombine.high %v79_v29, %v87_v30  ;;  %v41_v15 = vld [vmem:[%s6409_s0 + $0x68] sm:$0xff] }
  0x3e   :  { %4407 = vmatpush3.bf16.msra.mxu1 %v4881_v41  ;;  %4350 = vmatprep.subr.bf16.mxu0 %v4886_v44  ;;  %v94_v41 = vld [vmem:[%s6409_s0 + $0x210] sm:$0xff]  ;;  %v95_v44 = vld [vmem:[%s6409_s0 + $0x218] sm:$0xff] }
  0x3f   :  { %4408 = vmatprep.subr.bf16.mxu1 %v4888_v46  ;;  %v4911_v46 = vld [vmem:[%s6410_s1 + $0x228] sm:$0xff]  }
  0x41   :  { %4351 = vmatpush3.bf16.msra.mxu0 %v4887_v45  ;;  %v103_v45 = vld [vmem:[%s6409_s0 + $0x258] sm:$0xff] }
  0x42   :  { %4409 = vmatpush3.bf16.msra.mxu1 %v4889_v48  ;;  %4452 = vmatprep.subr.bf16.mxu0 %v4890_v52  ;;  %v4914_v48 = vld [vmem:[%s6410_s1 + $0x270] sm:$0xff]   ;;  %v4032_v52 = vcombine.high %v94_v41, %v102_v42 }
  0x43   :  { %1757 = vmatmul.mubr.bf16.gmra.mrb[16].mxu0 %v4027_v34  ;;  %4510 = vmatprep.subr.bf16.mxu1 %v4892_v53  ;;  %v4908_v34 = vld [vmem:[%s6410_s1 + $0x2e0] sm:$0xff]   ;;  %v4034_v53 = vcombine.high %v95_v44, %v103_v45 }
  0x44   :  { %1845 = vmatmul.mubr.bf16.gmra.mrb[16].mxu1 %v4029_v36  ;;  %1764 = vmatprep.mubr.bf16.mxu0 %v4044_v37  ;;  %v4016_v36 = vcombine.high %v78_v26, %v86_v28  ;;  %v4907_v37 = vld [vmem:[%s6410_s1 + $0x220] sm:$0xff]  }
  0x45   :  { %1852 = vmatprep.mubr.bf16.mxu1 %v4046_v39  ;;  %v4909_v39 = vld [vmem:[%s6410_s1 + $0x2a0] sm:$0xff]  }
  0x4b   :  { %1765 = vmatmul.mubr.bf16.gmra.mrb[20].mxu0 %v4043_v47  ;;  %v4913_v47 = vld [vmem:[%s6410_s1 + $0x2a8] sm:$0xff]  }
  0x4c   :  { %1853 = vmatmul.mubr.bf16.gmra.mrb[20].mxu1 %v4045_v49  ;;  %1772 = vmatprep.mubr.bf16.mxu0 %v4060_v50  ;;  %v4015_v49 = vcombine.low %v78_v26, %v86_v28  ;;  %v4916_v50 = vld [vmem:[%s6410_s1 + $0x2f0] sm:$0xff]   ;;  %v3973_v26 = vcombine.low %v33_v14, %v41_v15 }
  0x4d   :  { %1860 = vmatprep.mubr.bf16.mxu1 %v4062_v51  ;;  %v4017_v51 = vcombine.low %v79_v29, %v87_v30  ;;  %v4930_v29 = vld [vmem:[%s6410_s1 + $0x348] sm:$0xff]  }
  0x53   :  { %1773 = vmatmul.mubr.bf16.gmra.mrb[24].mxu0 %v4059_v58  ;;  %v4924_v58 = vld [vmem:[%s6410_s1 + $0x2f8] sm:$0xff]  }
  0x54   :  { %1861 = vmatmul.mubr.bf16.gmra.mrb[24].mxu1 %v4061_v59  ;;  %1900 = vmatprep.mubr.bf16.mxu0 %v3968_v60  ;;  %v118_v59 = vld [vmem:[%s6409_s0 + $0x2d0] sm:$0xff]  ;;  %v111_v60 = vld [vmem:[%s6409_s0 + $0x298] sm:$0xff] }
  0x55   :  { %1988 = vmatprep.mubr.bf16.mxu1 %v3970_v61  ;;  %v4923_v61 = vld [vmem:[%s6410_s1 + $0x238] sm:$0xff]  }
  0x5b   :  { %1901 = vmatmul.mubr.bf16.vlgmr.msra.gmra.mrb[28].mxu0 %v3967_v1  ;;  %v4031_v1 = vcombine.low %v94_v41, %v102_v42 }
  0x5c   :  { %1989 = vmatmul.mubr.bf16.vlgmr.msra.gmra.mrb[28].mxu1 %v3969_v3  ;;  %4453 = vmatpush3.bf16.msra.mxu0 %v4891_v4  ;;  %v4033_v3 = vcombine.low %v95_v44, %v103_v45  ;;  %v4048_v4 = vcombine.high %v110_v57, %v118_v59  ;;  %v4935_v44 = vld [vmem:[%s6410_s1 + $0x310] sm:$0xff]  }
  0x5d   :  { %4511 = vmatpush3.bf16.msra.mxu1 %v4893_v5  ;;  %1908 = vmatprep.mubr.bf16.mxu0 %v3984_v6  ;;  %v4050_v5 = vcombine.high %v111_v60, %v119_v62  ;;  %v126_v6 = vld [vmem:[%s6409_s0 + $0x310] sm:$0x11] }
  0x5e   :  { %1996 = vmatprep.mubr.bf16.mxu1 %v3986_v7  ;;  %4454 = vmatprep.subr.bf16.mxu0 %v4894_v8  ;;  %v127_v7 = vld [vmem:[%s6409_s0 + $0x318] sm:$0x11]  ;;  %v4047_v8 = vcombine.low %v110_v57, %v118_v59  ;;  %v4063_v16 = vcombine.low %v126_v6, %v126_v6  ;;  %v4937_v45 = vld [vmem:[%s6410_s1 + $0x390] sm:$0xff]  }
  0x5f   :  { %4512 = vmatprep.subr.bf16.mxu1 %v4896_v10  ;;  %v4064_v10 = vcombine.high %v126_v6, %v126_v6 }
  0x60   :  { %4455 = vmatpush3.bf16.msra.mxu0 %v4895_v9  ;;  %v4049_v9 = vcombine.low %v111_v60, %v119_v62  ;;  %v4943_v60 = vld [vmem:[%s6410_s1 + $0x320] sm:$0xff]  }
  0x61   :  { %4513 = vmatpush3.bf16.msra.mxu1 %v4897_v11  ;;  %4456 = vmatprep.subr.bf16.mxu0 %v4898_v12  ;;  %v4066_v11 = vcombine.high %v127_v7, %v127_v7  ;;  %v32_v12 = vld [vmem:[%s6409_s0 + $0x20] sm:$0xff] }
  0x62   :  { %4514 = vmatprep.subr.bf16.mxu1 %v4900_v17  ;;  %v4065_v17 = vcombine.low %v127_v7, %v127_v7 }
  0x63   :  { %1909 = vmatmul.mubr.bf16.gmra.mrb[32].mxu0 %v3983_v18  ;;  %v3972_v18 = vcombine.high %v32_v12, %v40_v13 }
  0x64   :  { %1997 = vmatmul.mubr.bf16.gmra.mrb[32].mxu1 %v3985_v19  ;;  %1916 = vmatprep.mubr.bf16.mxu0 %v4000_v20  ;;  %v3974_v19 = vcombine.high %v33_v14, %v41_v15  ;;  %v48_v20 = vld [vmem:[%s6409_s0 + $0xa0] sm:$0xff] }
  0x65   :  { %2004 = vmatprep.mubr.bf16.mxu1 %v4002_v22  ;;  %4457 = vmatpush3.bf16.msra.mxu0 %v4899_v21  ;;  %v56_v21 = vld [vmem:[%s6409_s0 + $0xe0] sm:$0xff]  ;;  %v3971_v22 = vcombine.low %v32_v12, %v40_v13 }
  0x66   :  { %4515 = vmatpush3.bf16.msra.mxu1 %v4901_v23  ;;  %4458 = vmatprep.subr.bf16.mxu0 %v4902_v24  ;;  %v4927_v23 = vld [vmem:[%s6410_s1 + $0x300] sm:$0xff]   ;;  %v49_v24 = vld [vmem:[%s6409_s0 + $0xa8] sm:$0xff]  ;;  %v3988_v28 = vcombine.high %v48_v20, %v56_v21 }
  0x67   :  { %4516 = vmatprep.subr.bf16.mxu1 %v4904_v27  ;;  %v4929_v27 = vld [vmem:[%s6410_s1 + $0x380] sm:$0xff]  }
  0x69   :  { %4459 = vmatpush3.bf16.msra.mxu0 %v4903_v25  ;;  %v57_v25 = vld [vmem:[%s6409_s0 + $0xe8] sm:$0xff] }
  0x6a   :  { %4517 = vmatpush3.bf16.msra.mxu1 %v4905_v31  ;;  %4460 = vmatprep.subr.bf16.mxu0 %v4906_v32  ;;  %v3990_v30 = vcombine.high %v49_v24, %v57_v25  ;;  %v4931_v31 = vld [vmem:[%s6410_s1 + $0x308] sm:$0xff]   ;;  %v3989_v41 = vcombine.low %v49_v24, %v57_v25 }
  0x6b   :  { %1917 = vmatmul.mubr.bf16.gmra.mrb[36].mxu0 %v3999_v33  ;;  %4518 = vmatprep.subr.bf16.mxu1 %v4908_v34  ;;  %v4932_v32 = vld [vmem:[%s6410_s1 + $0x3c8] sm:$0xff]   ;;  %v4934_v34 = vld [vmem:[%s6410_s1 + $0x350] sm:$0xff]  }
  0x6c   :  { %2005 = vmatmul.mubr.bf16.gmra.mrb[36].mxu1 %v4001_v35  ;;  %1924 = vmatprep.mubr.bf16.mxu0 %v4016_v36  ;;  %v4933_v33 = vld [vmem:[%s6410_s1 + $0x388] sm:$0xff]   ;;  %v64_v35 = vld [vmem:[%s6409_s0 + $0x120] sm:$0xff] }
  0x6d   :  { %2012 = vmatprep.mubr.bf16.mxu1 %v4018_v38  ;;  %4461 = vmatpush3.bf16.msra.mxu0 %v4907_v37  ;;  %v72_v36 = vld [vmem:[%s6409_s0 + $0x160] sm:$0xff]  ;;  %v65_v37 = vld [vmem:[%s6409_s0 + $0x128] sm:$0xff] }
  0x6e   :  { %4519 = vmatpush3.bf16.msra.mxu1 %v4909_v39  ;;  %4462 = vmatprep.subr.bf16.mxu0 %v4910_v40  ;;  %v73_v38 = vld [vmem:[%s6409_s0 + $0x168] sm:$0xff]  ;;  %v4936_v39 = vld [vmem:[%s6410_s1 + $0x3d0] sm:$0xff]   ;;  %v3987_v40 = vcombine.low %v48_v20, %v56_v21  ;;  %v4004_v42 = vcombine.high %v64_v35, %v72_v36 }
  0x6f   :  { %4520 = vmatprep.subr.bf16.mxu1 %v4912_v43  ;;  %v4006_v43 = vcombine.high %v65_v37, %v73_v38  ;;  %v4005_v57 = vcombine.low %v65_v37, %v73_v38 }
  0x71   :  { %4463 = vmatpush3.bf16.msra.mxu0 %v4911_v46  ;;  %v4938_v46 = vld [vmem:[%s6410_s1 + $0x358] sm:$0xff]  }
  0x72   :  { %4521 = vmatpush3.bf16.msra.mxu1 %v4913_v47  ;;  %4464 = vmatprep.subr.bf16.mxu0 %v4914_v48  ;;  %v4940_v47 = vld [vmem:[%s6410_s1 + $0x3d8] sm:$0xff]  }
  0x73   :  { %1925 = vmatmul.mubr.bf16.gmra.mrb[40].mxu0 %v4015_v49  ;;  %4522 = vmatprep.subr.bf16.mxu1 %v4916_v50  ;;  %v4939_v48 = vld [vmem:[%s6410_s1 + $0x318] sm:$0xff]   ;;  %v80_v49 = vld [vmem:[%s6409_s0 + $0x1a0] sm:$0xff] }
  0x74   :  { %2013 = vmatmul.mubr.bf16.gmra.mrb[40].mxu1 %v4017_v51  ;;  %1932 = vmatprep.mubr.bf16.mxu0 %v4032_v52  ;;  %v88_v50 = vld [vmem:[%s6409_s0 + $0x1e0] sm:$0xff]  ;;  %v81_v51 = vld [vmem:[%s6409_s0 + $0x1a8] sm:$0xff] }
  0x75   :  { %2020 = vmatprep.mubr.bf16.mxu1 %v4034_v53  ;;  %4465 = vmatpush3.bf16.msra.mxu0 %v4915_v54  ;;  %v89_v52 = vld [vmem:[%s6409_s0 + $0x1e8] sm:$0xff]  ;;  %v4941_v53 = vld [vmem:[%s6410_s1 + $0x398] sm:$0xff]   ;;  %v4942_v54 = vld [vmem:[%s6410_s1 + $0x360] sm:$0xff]  }
  0x76   :  { %4523 = vmatpush3.bf16.msra.mxu1 %v4917_v55  ;;  %4466 = vmatprep.subr.bf16.mxu0 %v4922_v56  ;;  %v4003_v55 = vcombine.low %v64_v35, %v72_v36  ;;  %v4944_v56 = vld [vmem:[%s6410_s1 + $0x3e0] sm:$0xff]   ;;  %v4022_v59 = vcombine.high %v81_v51, %v89_v52 }
  0x77   :  { %4524 = vmatprep.subr.bf16.mxu1 %v4924_v58  ;;  %v4020_v58 = vcombine.high %v80_v49, %v88_v50 }
  0x79   :  { %4467 = vmatpush3.bf16.msra.mxu0 %v4923_v61 }
  0x7a   :  { %4525 = vmatpush3.bf16.msra.mxu1 %v4925_v63  ;;  %4568 = vmatprep.subr.bf16.mxu0 %v4926_v0 }
  0x7b   :  { %1933 = vmatmul.mubr.bf16.gmra.mrb[44].mxu0 %v4031_v1  ;;  %4626 = vmatprep.subr.bf16.mxu1 %v4928_v2 }
  0x7c   :  { %2021 = vmatmul.mubr.bf16.gmra.mrb[44].mxu1 %v4033_v3  ;;  %1940 = vmatprep.mubr.bf16.mxu0 %v4048_v4 }
  0x7d   :  { %2028 = vmatprep.mubr.bf16.mxu1 %v4050_v5 }
  0x83   :  { %1941 = vmatmul.mubr.bf16.gmra.mrb[48].mxu0 %v4047_v8 }
  0x84   :  { %2029 = vmatmul.mubr.bf16.gmra.mrb[48].mxu1 %v4049_v9  ;;  %1948 = vmatprep.mubr.bf16.mxu0 %v4064_v10 }
  0x85   :  { %2036 = vmatprep.mubr.bf16.mxu1 %v4066_v11 }
  0x8b   :  { %1949 = vmatmul.mubr.bf16.gmra.mrb[52].mxu0 %v4063_v16 }
  0x8c   :  { %2037 = vmatmul.mubr.bf16.gmra.mrb[52].mxu1 %v4065_v17  ;;  %2076 = vmatprep.mubr.bf16.mxu0 %v3972_v18 }
  0x8d   :  { %2164 = vmatprep.mubr.bf16.mxu1 %v3974_v19 }
  0x93   :  { %2077 = vmatmul.mubr.bf16.vlgmr.msra.gmra.mrb[56].mxu0 %v3971_v22 }
  0x94   :  { %2165 = vmatmul.mubr.bf16.vlgmr.msra.gmra.mrb[56].mxu1 %v3973_v26  ;;  %4569 = vmatpush3.bf16.msra.mxu0 %v4927_v23 }
  0x95   :  { %4627 = vmatpush3.bf16.msra.mxu1 %v4929_v27  ;;  %2084 = vmatprep.mubr.bf16.mxu0 %v3988_v28 }
  0x96   :  { %2172 = vmatprep.mubr.bf16.mxu1 %v3990_v30  ;;  %4570 = vmatprep.subr.bf16.mxu0 %v4930_v29 }
  0x97   :  { %4628 = vmatprep.subr.bf16.mxu1 %v4932_v32 }
  0x98   :  { %4571 = vmatpush3.bf16.msra.mxu0 %v4931_v31 }
  0x99   :  { %4629 = vmatpush3.bf16.msra.mxu1 %v4933_v33  ;;  %4572 = vmatprep.subr.bf16.mxu0 %v4934_v34 }
  0x9a   :  { %4630 = vmatprep.subr.bf16.mxu1 %v4936_v39 }
  0x9b   :  { %2085 = vmatmul.mubr.bf16.gmra.mrb[60].mxu0 %v3987_v40 }
  0x9c   :  { %2173 = vmatmul.mubr.bf16.gmra.mrb[60].mxu1 %v3989_v41  ;;  %2092 = vmatprep.mubr.bf16.mxu0 %v4004_v42 }
  0x9d   :  { %2180 = vmatprep.mubr.bf16.mxu1 %v4006_v43  ;;  %4573 = vmatpush3.bf16.msra.mxu0 %v4935_v44 }
  0x9e   :  { %4631 = vmatpush3.bf16.msra.mxu1 %v4937_v45  ;;  %4574 = vmatprep.subr.bf16.mxu0 %v4938_v46 }
  0x9f   :  { %4632 = vmatprep.subr.bf16.mxu1 %v4940_v47 }
  0xa1   :  { %4575 = vmatpush3.bf16.msra.mxu0 %v4939_v48 }
  0xa2   :  { %14 = vsyncpa [#allocation5], 0  ;;  %4633 = vmatpush3.bf16.msra.mxu1 %v4941_v53  ;;  %4576 = vmatprep.subr.bf16.mxu0 %v4942_v54  ;;  %v4945_v61 = vld [vmem:[%s6410_s1 + $0x3a0] sm:$0xff]   ;;  %v4946_v62 = vld [vmem:[%s6410_s1 + $0x368] sm:$0xff]   ;;  %v4019_v7 = vcombine.low %v80_v49, %v88_v50  ;;  %v4021_v9 = vcombine.low %v81_v51, %v89_v52  ;;  %vm3849_vm0 = vcmask 1040384   ;;  %vm5017_vm1 = vmmov 0  }
  0xa3   :  { %2093 = vmatmul.mubr.bf16.gmra.mrb[64].mxu0 %v4003_v55  ;;  %4634 = vmatprep.subr.bf16.mxu1 %v4944_v56  ;;  %v4948_v63 = vld [vmem:[%s6410_s1 + $0x3e8] sm:$0xff]   ;;  %v96_v0 = vld [vmem:[%s6409_s0 + $0x220] sm:$0xff]  ;;  %v4950_v6 = vld [vmem:[%s6410_s1 + $0x370] sm:$0xff]   ;;  %vm2453_vm2 = vcmask 1041408   ;;  %vm2449_vm3 = vcmask 801792   ;;  %vm3842_vm4 = vcmask 400384  }
  0xa4   :  { %2181 = vmatmul.mubr.bf16.gmra.mrb[64].mxu1 %v4005_v57  ;;  %2100 = vmatprep.mubr.bf16.mxu0 %v4020_v58  ;;  %v104_v1 = vld [vmem:[%s6409_s0 + $0x260] sm:$0xff]  ;;  %v97_v2 = vld [vmem:[%s6409_s0 + $0x228] sm:$0xff]  ;;  %v4952_v8 = vld [vmem:[%s6410_s1 + $0x3f0] sm:$0xff]   ;;  %s5019_s19 = smov [#allocation4]   ;;  %vm2527_vm5 = vcmask 254976  }
  0xa5   :  { %2188 = vmatprep.mubr.bf16.mxu1 %v4022_v59  ;;  %4577 = vmatpush3.bf16.msra.mxu0 %v4943_v60  ;;  %v4947_v3 = vld [vmem:[%s6410_s1 + $0x328] sm:$0xff]   ;;  %v4036_v10 = vcombine.high %v96_v0, %v104_v1  ;;  %v4951_v12 = vld [vmem:[%s6410_s1 + $0x330] sm:$0xff]   ;;  %v4958_v14 = vld [vmem:[%s6410_s1 + $0x378] sm:$0xff]   ;;  %v4035_v22 = vcombine.low %v96_v0, %v104_v1  ;;  %s3951_s20 = sshll.u32 %s5019_s19, 4  ;;  %s3952_s20 = int_to_ptr.vmem [resolvable:$true] %s3951_s20 }
  0xa6   :  { %v105_v4 = vld [vmem:[%s6409_s0 + $0x268] sm:$0xff]  ;;  %4635 = vmatpush3.bf16.msra.mxu1 %v4945_v61  ;;  %4578 = vmatprep.subr.bf16.mxu0 %v4946_v62  ;;  %v4953_v13 = vld [vmem:[%s6410_s1 + $0x3b0] sm:$0xff]   ;;  %v4960_v15 = vld [vmem:[%s6410_s1 + $0x3f8] sm:$0xff]   ;;  %p4971_p1 = scmp.lt.s32.totalorder %s3952_s20, %s3952_s20 }
  0xa7   :  { %v4949_v5 = vld [vmem:[%s6410_s1 + $0x3a8] sm:$0xff]   ;;  %4636 = vmatprep.subr.bf16.mxu1 %v4948_v63  ;;  %v4038_v11 = vcombine.high %v97_v2, %v105_v4  ;;  %v112_v16 = vld [vmem:[%s6409_s0 + $0x2a0] sm:$0xff]  ;;  %v4959_v18 = vld [vmem:[%s6410_s1 + $0x338] sm:$0xff]   ;;  %v4037_v23 = vcombine.low %v97_v2, %v105_v4 }
  0xa8   :  { %v120_v17 = vld [vmem:[%s6409_s0 + $0x2e0] sm:$0xff]  ;;  %v113_v19 = vld [vmem:[%s6409_s0 + $0x2a8] sm:$0xff]  ;;  %v4961_v21 = vld [vmem:[%s6410_s1 + $0x3b8] sm:$0xff]  }
  0xa9   :  { %4579 = vmatpush3.bf16.msra.mxu0 %v4947_v3  ;;  %v121_v20 = vld [vmem:[%s6409_s0 + $0x2e8] sm:$0xff]  ;;  %v4052_v24 = vcombine.high %v112_v16, %v120_v17  ;;  %v128_v26 = vld [vmem:[%s6409_s0 + $0x320] sm:$0x11]  ;;  %v4051_v28 = vcombine.low %v112_v16, %v120_v17  ;;  %v34_v32 = vld [vmem:[%s6409_s0 + $0x30] sm:$0xff] }
  0xaa   :  { %4637 = vmatpush3.bf16.msra.mxu1 %v4949_v5  ;;  %4580 = vmatprep.subr.bf16.mxu0 %v4950_v6  ;;  %v4054_v25 = vcombine.high %v113_v19, %v121_v20  ;;  %v129_v27 = vld [vmem:[%s6409_s0 + $0x328] sm:$0x11]  ;;  %v4053_v29 = vcombine.low %v113_v19, %v121_v20  ;;  %v4068_v30 = vcombine.high %v128_v26, %v128_v26  ;;  %v42_v33 = vld [vmem:[%s6409_s0 + $0x70] sm:$0xff]  ;;  %v35_v34 = vld [vmem:[%s6409_s0 + $0x38] sm:$0xff] }
  0xab   :  { %2101 = vmatmul.mubr.bf16.gmra.mrb[68].mxu0 %v4019_v7  ;;  %4638 = vmatprep.subr.bf16.mxu1 %v4952_v8  ;;  %v4070_v31 = vcombine.high %v129_v27, %v129_v27  ;;  %v43_v35 = vld [vmem:[%s6409_s0 + $0x78] sm:$0xff]  ;;  %v4067_v36 = vcombine.low %v128_v26, %v128_v26  ;;  %v4069_v37 = vcombine.low %v129_v27, %v129_v27  ;;  %v50_v40 = vld [vmem:[%s6409_s0 + $0xb0] sm:$0xff] }
  0xac   :  { %2189 = vmatmul.mubr.bf16.gmra.mrb[68].mxu1 %v4021_v9  ;;  %2108 = vmatprep.mubr.bf16.mxu0 %v4036_v10  ;;  %v3976_v38 = vcombine.high %v34_v32, %v42_v33  ;;  %v3978_v39 = vcombine.high %v35_v34, %v43_v35  ;;  %v58_v41 = vld [vmem:[%s6409_s0 + $0xf0] sm:$0xff]  ;;  %v51_v42 = vld [vmem:[%s6409_s0 + $0xb8] sm:$0xff]  ;;  %v3975_v44 = vcombine.low %v34_v32, %v42_v33 }
  0xad   :  { %2196 = vmatprep.mubr.bf16.mxu1 %v4038_v11  ;;  %4581 = vmatpush3.bf16.msra.mxu0 %v4951_v12  ;;  %v59_v43 = vld [vmem:[%s6409_s0 + $0xf8] sm:$0xff]  ;;  %v3977_v45 = vcombine.low %v35_v34, %v43_v35  ;;  %v3992_v46 = vcombine.high %v50_v40, %v58_v41  ;;  %v66_v48 = vld [vmem:[%s6409_s0 + $0x130] sm:$0xff]  ;;  %v3991_v52 = vcombine.low %v50_v40, %v58_v41 }
  0xae   :  { %4639 = vmatpush3.bf16.msra.mxu1 %v4953_v13  ;;  %4582 = vmatprep.subr.bf16.mxu0 %v4958_v14  ;;  %v3994_v47 = vcombine.high %v51_v42, %v59_v43  ;;  %v74_v49 = vld [vmem:[%s6409_s0 + $0x170] sm:$0xff]  ;;  %v67_v50 = vld [vmem:[%s6409_s0 + $0x138] sm:$0xff]  ;;  %v3993_v53 = vcombine.low %v51_v42, %v59_v43 }
  0xaf   :  { %4640 = vmatprep.subr.bf16.mxu1 %v4960_v15  ;;  %v75_v51 = vld [vmem:[%s6409_s0 + $0x178] sm:$0xff]  ;;  %v4008_v54 = vcombine.high %v66_v48, %v74_v49  ;;  %v82_v56 = vld [vmem:[%s6409_s0 + $0x1b0] sm:$0xff]  ;;  %v4007_v60 = vcombine.low %v66_v48, %v74_v49 }
  0xb0   :  { %v4010_v55 = vcombine.high %v67_v50, %v75_v51  ;;  %v90_v57 = vld [vmem:[%s6409_s0 + $0x1f0] sm:$0xff]  ;;  %v83_v58 = vld [vmem:[%s6409_s0 + $0x1b8] sm:$0xff]  ;;  %v4009_v61 = vcombine.low %v67_v50, %v75_v51 }
  0xb1   :  { %4583 = vmatpush3.bf16.msra.mxu0 %v4959_v18  ;;  %v91_v59 = vld [vmem:[%s6409_s0 + $0x1f8] sm:$0xff]  ;;  %v4024_v62 = vcombine.high %v82_v56, %v90_v57  ;;  %v98_v0 = vld [vmem:[%s6409_s0 + $0x230] sm:$0xff]  ;;  %v4023_v4 = vcombine.low %v82_v56, %v90_v57 }
  0xb2   :  { %4641 = vmatpush3.bf16.msra.mxu1 %v4961_v21  ;;  %v4026_v63 = vcombine.high %v83_v58, %v91_v59  ;;  %v106_v1 = vld [vmem:[%s6409_s0 + $0x270] sm:$0xff]  ;;  %v99_v2 = vld [vmem:[%s6409_s0 + $0x238] sm:$0xff]  ;;  %v4025_v5 = vcombine.low %v83_v58, %v91_v59 }
  0xb3   :  { %2109 = vmatmul.mubr.bf16.gmra.mrb[72].mxu0 %v4035_v22  ;;  %v107_v3 = vld [vmem:[%s6409_s0 + $0x278] sm:$0xff]  ;;  %v4040_v6 = vcombine.high %v98_v0, %v106_v1  ;;  %v114_v8 = vld [vmem:[%s6409_s0 + $0x2b0] sm:$0xff]  ;;  %v4039_v12 = vcombine.low %v98_v0, %v106_v1 }
  0xb4   :  { %2197 = vmatmul.mubr.bf16.gmra.mrb[72].mxu1 %v4037_v23  ;;  %2116 = vmatprep.mubr.bf16.mxu0 %v4052_v24  ;;  %v4042_v7 = vcombine.high %v99_v2, %v107_v3  ;;  %v122_v9 = vld [vmem:[%s6409_s0 + $0x2f0] sm:$0xff]  ;;  %v115_v10 = vld [vmem:[%s6409_s0 + $0x2b8] sm:$0xff]  ;;  %v4041_v13 = vcombine.low %v99_v2, %v107_v3 }
  0xb5   :  { %2204 = vmatprep.mubr.bf16.mxu1 %v4054_v25  ;;  %v123_v11 = vld [vmem:[%s6409_s0 + $0x2f8] sm:$0xff]  ;;  %v4056_v14 = vcombine.high %v114_v8, %v122_v9  ;;  %v130_v16 = vld [vmem:[%s6409_s0 + $0x330] sm:$0x11]  ;;  %v4055_v18 = vcombine.low %v114_v8, %v122_v9 }
  0xb6   :  { %v4058_v15 = vcombine.high %v115_v10, %v123_v11  ;;  %v131_v17 = vld [vmem:[%s6409_s0 + $0x338] sm:$0x11]  ;;  %v4057_v19 = vcombine.low %v115_v10, %v123_v11  ;;  %v4072_v20 = vcombine.high %v130_v16, %v130_v16  ;;  %v4071_v25 = vcombine.low %v130_v16, %v130_v16  ;;  %s5016_s0 = smov 120  }
  0xb7   :  { %v4074_v21 = vcombine.high %v131_v17, %v131_v17 }
  0xbb   :  { %2117 = vmatmul.mubr.bf16.gmra.mrb[76].mxu0 %v4051_v28 }
  0xbc   :  { %2205 = vmatmul.mubr.bf16.gmra.mrb[76].mxu1 %v4053_v29  ;;  %2124 = vmatprep.mubr.bf16.mxu0 %v4068_v30  ;;  %v4073_v29 = vcombine.low %v131_v17, %v131_v17 }
  0xbd   :  { %2212 = vmatprep.mubr.bf16.mxu1 %v4070_v31 }
  0xc3   :  { %2125 = vmatmul.mubr.bf16.gmra.mrb[80].mxu0 %v4067_v36 }
  0xc4   :  { %2213 = vmatmul.mubr.bf16.gmra.mrb[80].mxu1 %v4069_v37  ;;  %2252 = vmatprep.mubr.bf16.mxu0 %v3976_v38 }
  0xc5   :  { %2340 = vmatprep.mubr.bf16.mxu1 %v3978_v39 }
  0xcb   :  { %2253 = vmatmul.mubr.bf16.vlgmr.msra.gmra.mrb[84].mxu0 %v3975_v44 }
  0xcc   :  { %2341 = vmatmul.mubr.bf16.vlgmr.msra.gmra.mrb[84].mxu1 %v3977_v45  ;;  %2260 = vmatprep.mubr.bf16.mxu0 %v3992_v46 }
  0xcd   :  { %2348 = vmatprep.mubr.bf16.mxu1 %v3994_v47 }
  0xd3   :  { %2261 = vmatmul.mubr.bf16.gmra.mrb[88].mxu0 %v3991_v52 }
  0xd4   :  { %2349 = vmatmul.mubr.bf16.gmra.mrb[88].mxu1 %v3993_v53  ;;  %2268 = vmatprep.mubr.bf16.mxu0 %v4008_v54 }
  0xd5   :  { %2356 = vmatprep.mubr.bf16.mxu1 %v4010_v55 }
  0xdb   :  { %2269 = vmatmul.mubr.bf16.gmra.mrb[92].mxu0 %v4007_v60 }
  0xdc   :  { %2357 = vmatmul.mubr.bf16.gmra.mrb[92].mxu1 %v4009_v61  ;;  %2276 = vmatprep.mubr.bf16.mxu0 %v4024_v62 }
  0xdd   :  { %2364 = vmatprep.mubr.bf16.mxu1 %v4026_v63 }
  0xe3   :  { %2277 = vmatmul.mubr.bf16.gmra.mrb[96].mxu0 %v4023_v4 }
  0xe4   :  { %2365 = vmatmul.mubr.bf16.gmra.mrb[96].mxu1 %v4025_v5  ;;  %2284 = vmatprep.mubr.bf16.mxu0 %v4040_v6 }
  0xe5   :  { %2372 = vmatprep.mubr.bf16.mxu1 %v4042_v7 }
  0xeb   :  { %2285 = vmatmul.mubr.bf16.gmra.mrb[100].mxu0 %v4039_v12 }
  0xec   :  { %2373 = vmatmul.mubr.bf16.gmra.mrb[100].mxu1 %v4041_v13  ;;  %2292 = vmatprep.mubr.bf16.mxu0 %v4056_v14 }
  0xed   :  { %2380 = vmatprep.mubr.bf16.mxu1 %v4058_v15 }
  0xf3   :  { %2293 = vmatmul.mubr.bf16.gmra.mrb[104].mxu0 %v4055_v18 }
  0xf4   :  { %2381 = vmatmul.mubr.bf16.gmra.mrb[104].mxu1 %v4057_v19  ;;  %2300 = vmatprep.mubr.bf16.mxu0 %v4072_v20 }
  0xf5   :  { %2388 = vmatprep.mubr.bf16.mxu1 %v4074_v21 }
  0xf6   :  { %v4236_v22 = vpop.f32.mrb[0].mxu0 }
  0xf7   :  { %v4294_v23 = vpop.f32.mrb[0].mxu1  ;;  %v4237_v24 = vpop.f32.mrb[1].mxu0 }
  0xf8   :  { %v4238_v26 = vadd.f32 %v4237_v24, %v4236_v22  ;;  %v4295_v27 = vpop.f32.mrb[1].mxu1  ;;  %v4239_v28 = vpop.f32.mrb[2].mxu0 }
  0xf9   :  { %v4296_v30 = vadd.f32 %v4295_v27, %v4294_v23  ;;  %v4297_v31 = vpop.f32.mrb[2].mxu1  ;;  %v4240_v32 = vpop.f32.mrb[3].mxu0 }
  0xfa   :  { %v4241_v33 = vadd.f32 %v4240_v32, %v4239_v28  ;;  %v4298_v34 = vpop.f32.mrb[3].mxu1 }
  0xfb   :  { %v5759_v35 = vadd.f32 %v4296_v30, %v4238_v26  ;;  %v4299_v36 = vadd.f32 %v4298_v34, %v4297_v31  ;;  %2301 = vmatmul.mubr.bf16.gmra.mrb[108].mxu0 %v4071_v25 }
  0xfc   :  { %2389 = vmatmul.mubr.bf16.gmra.mrb[108].mxu1 %v4073_v29 }
  0xfd   :  { %v5761_v37 = vadd.f32 %v4299_v36, %v4241_v33 }
  0xfe   :  { %v4242_v38 = vpop.f32.mrb[4].mxu0 }
  0xff   :  { %v4300_v39 = vpop.f32.mrb[4].mxu1  ;;  %v4243_v40 = vpop.f32.mrb[5].mxu0 }
 0x100   :  { %v4244_v41 = vadd.f32 %v4243_v40, %v4242_v38  ;;  %v4301_v42 = vpop.f32.mrb[5].mxu1  ;;  %v4245_v43 = vpop.f32.mrb[6].mxu0 }
 0x101   :  { %v4302_v44 = vadd.f32 %v4301_v42, %v4300_v39  ;;  %v4303_v45 = vpop.f32.mrb[6].mxu1  ;;  %v4246_v46 = vpop.f32.mrb[7].mxu0 }
 0x102   :  { %v4247_v47 = vadd.f32 %v4246_v46, %v4245_v43  ;;  %v4304_v48 = vpop.f32.mrb[7].mxu1 }
 0x103   :  { %v5763_v49 = vadd.f32 %v4302_v44, %v4244_v41  ;;  %v4305_v50 = vadd.f32 %v4304_v48, %v4303_v45 }
 0x105   :  { %v5765_v51 = vadd.f32 %v4305_v50, %v4247_v47 }
 0x106   :  { %v4248_v52 = vpop.f32.mrb[8].mxu0 }
 0x107   :  { %v4306_v53 = vpop.f32.mrb[8].mxu1  ;;  %v4249_v54 = vpop.f32.mrb[9].mxu0 }
 0x108   :  { %v4250_v55 = vadd.f32 %v4249_v54, %v4248_v52  ;;  %v4307_v56 = vpop.f32.mrb[9].mxu1  ;;  %v4251_v57 = vpop.f32.mrb[10].mxu0 }
 0x109   :  { %v4308_v58 = vadd.f32 %v4307_v56, %v4306_v53  ;;  %v4309_v59 = vpop.f32.mrb[10].mxu1  ;;  %v4252_v60 = vpop.f32.mrb[11].mxu0 }
 0x10a   :  { %v4253_v61 = vadd.f32 %v4252_v60, %v4251_v57  ;;  %v4310_v62 = vpop.f32.mrb[11].mxu1 }
 0x10b   :  { %v5767_v63 = vadd.f32 %v4308_v58, %v4250_v55  ;;  %v4311_v0 = vadd.f32 %v4310_v62, %v4309_v59 }
 0x10d   :  { %v5769_v1 = vadd.f32 %v4311_v0, %v4253_v61 }
 0x10e   :  { %v4254_v2 = vpop.f32.mrb[12].mxu0 }
 0x10f   :  { %v4312_v3 = vpop.f32.mrb[12].mxu1  ;;  %v4255_v4 = vpop.f32.mrb[13].mxu0 }
 0x110   :  { %v4256_v5 = vadd.f32 %v4255_v4, %v4254_v2  ;;  %v4313_v6 = vpop.f32.mrb[13].mxu1  ;;  %v4257_v7 = vpop.f32.mrb[14].mxu0 }
 0x111   :  { %v4314_v8 = vadd.f32 %v4313_v6, %v4312_v3  ;;  %v4315_v9 = vpop.f32.mrb[14].mxu1  ;;  %v4258_v10 = vpop.f32.mrb[15].mxu0 }
 0x112   :  { %v4259_v11 = vadd.f32 %v4258_v10, %v4257_v7  ;;  %v4316_v12 = vpop.f32.mrb[15].mxu1 }
 0x113   :  { %v5771_v13 = vadd.f32 %v4314_v8, %v4256_v5  ;;  %v4317_v14 = vadd.f32 %v4316_v12, %v4315_v9 }
 0x115   :  { %v5773_v15 = vadd.f32 %v4317_v14, %v4259_v11 }
 0x116   :  { %v4260_v16 = vpop.f32.mrb[16].mxu0 }
 0x117   :  { %v4318_v17 = vpop.f32.mrb[16].mxu1  ;;  %v4261_v18 = vpop.f32.mrb[17].mxu0 }
 0x118   :  { %v4262_v19 = vadd.f32 %v4261_v18, %v4260_v16  ;;  %v4319_v20 = vpop.f32.mrb[17].mxu1  ;;  %v4263_v21 = vpop.f32.mrb[18].mxu0 }
 0x119   :  { %v4320_v22 = vadd.f32 %v4319_v20, %v4318_v17  ;;  %v4321_v23 = vpop.f32.mrb[18].mxu1  ;;  %v4264_v24 = vpop.f32.mrb[19].mxu0 }
 0x11a   :  { %v4265_v25 = vadd.f32 %v4264_v24, %v4263_v21  ;;  %v4322_v26 = vpop.f32.mrb[19].mxu1 }
 0x11b   :  { %v5775_v27 = vadd.f32 %v4320_v22, %v4262_v19  ;;  %v4323_v28 = vadd.f32 %v4322_v26, %v4321_v23 }
 0x11d   :  { %v5777_v29 = vadd.f32 %v4323_v28, %v4265_v25 }
 0x11e   :  { %v4266_v30 = vpop.f32.mrb[20].mxu0 }
 0x11f   :  { %v4324_v31 = vpop.f32.mrb[20].mxu1  ;;  %v4267_v32 = vpop.f32.mrb[21].mxu0 }
 0x120   :  { %v4268_v33 = vadd.f32 %v4267_v32, %v4266_v30  ;;  %v4325_v34 = vpop.f32.mrb[21].mxu1  ;;  %v4269_v36 = vpop.f32.mrb[22].mxu0 }
 0x121   :  { %v4326_v38 = vadd.f32 %v4325_v34, %v4324_v31  ;;  %v4327_v39 = vpop.f32.mrb[22].mxu1  ;;  %v4270_v40 = vpop.f32.mrb[23].mxu0 }
 0x122   :  { %v4271_v41 = vadd.f32 %v4270_v40, %v4269_v36  ;;  %v4328_v42 = vpop.f32.mrb[23].mxu1 }
 0x123   :  { %v5779_v43 = vadd.f32 %v4326_v38, %v4268_v33  ;;  %v4329_v44 = vadd.f32 %v4328_v42, %v4327_v39 }
 0x125   :  { %v5781_v45 = vadd.f32 %v4329_v44, %v4271_v41 }
 0x126   :  { %v4272_v46 = vpop.f32.mrb[24].mxu0 }
 0x127   :  { %v4330_v47 = vpop.f32.mrb[24].mxu1  ;;  %v4273_v48 = vpop.f32.mrb[25].mxu0 }
 0x128   :  { %v4274_v50 = vadd.f32 %v4273_v48, %v4272_v46  ;;  %v4331_v52 = vpop.f32.mrb[25].mxu1  ;;  %v4275_v53 = vpop.f32.mrb[26].mxu0 }
 0x129   :  { %v4332_v54 = vadd.f32 %v4331_v52, %v4330_v47  ;;  %v4333_v55 = vpop.f32.mrb[26].mxu1  ;;  %v4276_v56 = vpop.f32.mrb[27].mxu0 }
 0x12a   :  { %v4334_v57 = vpop.f32.mrb[27].mxu1 }
 0x12b   :  { %v5783_v58 = vadd.f32 %v4332_v54, %v4274_v50 }
 0x12e   :  { %v4352_v59 = vpop.f32.mrb[28].mxu0 }
 0x12f   :  { %v4410_v60 = vpop.f32.mrb[28].mxu1  ;;  %v4353_v61 = vpop.f32.mrb[29].mxu0 }
 0x130   :  { %v4354_v62 = vadd.f32 %v4353_v61, %v4352_v59  ;;  %v4411_v0 = vpop.f32.mrb[29].mxu1  ;;  %v4355_v2 = vpop.f32.mrb[30].mxu0 }
 0x131   :  { %v4412_v3 = vadd.f32 %v4411_v0, %v4410_v60  ;;  %v4413_v4 = vpop.f32.mrb[30].mxu1  ;;  %v4356_v5 = vpop.f32.mrb[31].mxu0 }
 0x132   :  { %v1903_v6 = vadd.f32 %v4354_v62, %v5759_v35  ;;  %v4357_v7 = vadd.f32 %v4356_v5, %v4355_v2  ;;  %v4414_v8 = vpop.f32.mrb[31].mxu1 }
 0x133   :  { %v4415_v9 = vadd.f32 %v4414_v8, %v4413_v4 }
 0x134   :  { %v5786_v10 = vadd.f32 %v4412_v3, %v1903_v6  ;;  %v1906_v11 = vadd.f32 %v4357_v7, %v5761_v37 }
 0x136   :  { %v5789_v12 = vadd.f32 %v4415_v9, %v1906_v11  ;;  %v4358_v14 = vpop.f32.mrb[32].mxu0 }
 0x137   :  { %v4416_v16 = vpop.f32.mrb[32].mxu1  ;;  %v4359_v17 = vpop.f32.mrb[33].mxu0 }
 0x138   :  { %v4360_v18 = vadd.f32 %v4359_v17, %v4358_v14  ;;  %v4417_v19 = vpop.f32.mrb[33].mxu1  ;;  %v4361_v20 = vpop.f32.mrb[34].mxu0 }
 0x139   :  { %v4418_v21 = vadd.f32 %v4417_v19, %v4416_v16  ;;  %v4419_v22 = vpop.f32.mrb[34].mxu1  ;;  %v4362_v23 = vpop.f32.mrb[35].mxu0 }
 0x13a   :  { %v1911_v35 = vadd.f32 %v4360_v18, %v5763_v49  ;;  %v4363_v24 = vadd.f32 %v4362_v23, %v4361_v20  ;;  %v4420_v25 = vpop.f32.mrb[35].mxu1 }
 0x13b   :  { %v4421_v26 = vadd.f32 %v4420_v25, %v4419_v22 }
 0x13c   :  { %v5792_v28 = vadd.f32 %v4418_v21, %v1911_v35  ;;  %v1914_v37 = vadd.f32 %v4363_v24, %v5765_v51 }
 0x13e   :  { %v5795_v30 = vadd.f32 %v4421_v26, %v1914_v37  ;;  %v4364_v31 = vpop.f32.mrb[36].mxu0 }
 0x13f   :  { %v4422_v32 = vpop.f32.mrb[36].mxu1  ;;  %v4365_v33 = vpop.f32.mrb[37].mxu0 }
 0x140   :  { %v4366_v34 = vadd.f32 %v4365_v33, %v4364_v31  ;;  %v4423_v36 = vpop.f32.mrb[37].mxu1  ;;  %v4367_v38 = vpop.f32.mrb[38].mxu0 }
 0x141   :  { %v4424_v39 = vadd.f32 %v4423_v36, %v4422_v32  ;;  %v4425_v40 = vpop.f32.mrb[38].mxu1  ;;  %v4368_v41 = vpop.f32.mrb[39].mxu0 }
 0x142   :  { %v1919_v49 = vadd.f32 %v4366_v34, %v5767_v63  ;;  %v4369_v42 = vadd.f32 %v4368_v41, %v4367_v38  ;;  %v4426_v44 = vpop.f32.mrb[39].mxu1 }
 0x143   :  { %v4427_v46 = vadd.f32 %v4426_v44, %v4425_v40 }
 0x144   :  { %v5798_v47 = vadd.f32 %v4424_v39, %v1919_v49  ;;  %v1922_v51 = vadd.f32 %v4369_v42, %v5769_v1 }
 0x146   :  { %v5801_v48 = vadd.f32 %v4427_v46, %v1922_v51  ;;  %v4370_v50 = vpop.f32.mrb[40].mxu0 }
 0x147   :  { %v4428_v52 = vpop.f32.mrb[40].mxu1  ;;  %v4371_v53 = vpop.f32.mrb[41].mxu0 }
 0x148   :  { %v4372_v54 = vadd.f32 %v4371_v53, %v4370_v50  ;;  %v4429_v55 = vpop.f32.mrb[41].mxu1  ;;  %v4373_v56 = vpop.f32.mrb[42].mxu0 }
 0x149   :  { %v4430_v57 = vadd.f32 %v4429_v55, %v4428_v52  ;;  %v4431_v59 = vpop.f32.mrb[42].mxu1  ;;  %v4374_v60 = vpop.f32.mrb[43].mxu0 }
 0x14a   :  { %v1927_v63 = vadd.f32 %v4372_v54, %v5771_v13  ;;  %v4375_v61 = vadd.f32 %v4374_v60, %v4373_v56  ;;  %v4432_v62 = vpop.f32.mrb[43].mxu1 }
 0x14b   :  { %v4433_v0 = vadd.f32 %v4432_v62, %v4431_v59 }
 0x14c   :  { %v5804_v2 = vadd.f32 %v4430_v57, %v1927_v63  ;;  %v1930_v1 = vadd.f32 %v4375_v61, %v5773_v15 }
 0x14e   :  { %v5807_v3 = vadd.f32 %v4433_v0, %v1930_v1  ;;  %v4376_v4 = vpop.f32.mrb[44].mxu0 }
 0x14f   :  { %v4434_v5 = vpop.f32.mrb[44].mxu1  ;;  %v4377_v6 = vpop.f32.mrb[45].mxu0 }
 0x150   :  { %v4378_v7 = vadd.f32 %v4377_v6, %v4376_v4  ;;  %v4435_v8 = vpop.f32.mrb[45].mxu1  ;;  %v4379_v9 = vpop.f32.mrb[46].mxu0 }
 0x151   :  { %v4436_v11 = vadd.f32 %v4435_v8, %v4434_v5  ;;  %v4437_v14 = vpop.f32.mrb[46].mxu1  ;;  %v4380_v16 = vpop.f32.mrb[47].mxu0 }
 0x152   :  { %v1935_v13 = vadd.f32 %v4378_v7, %v5775_v27  ;;  %v4381_v17 = vadd.f32 %v4380_v16, %v4379_v9  ;;  %v4438_v18 = vpop.f32.mrb[47].mxu1 }
 0x153   :  { %v4439_v19 = vadd.f32 %v4438_v18, %v4437_v14 }
 0x154   :  { %v5810_v20 = vadd.f32 %v4436_v11, %v1935_v13  ;;  %v1938_v15 = vadd.f32 %v4381_v17, %v5777_v29 }
 0x156   :  { %v5813_v21 = vadd.f32 %v4439_v19, %v1938_v15  ;;  %v4382_v22 = vpop.f32.mrb[48].mxu0 }
 0x157   :  { %v4440_v23 = vpop.f32.mrb[48].mxu1  ;;  %v4383_v35 = vpop.f32.mrb[49].mxu0 }
 0x158   :  { %v4384_v24 = vadd.f32 %v4383_v35, %v4382_v22  ;;  %v4441_v25 = vpop.f32.mrb[49].mxu1  ;;  %v4385_v26 = vpop.f32.mrb[50].mxu0 }
 0x159   :  { %v4442_v37 = vadd.f32 %v4441_v25, %v4440_v23  ;;  %v4443_v31 = vpop.f32.mrb[50].mxu1  ;;  %v4386_v32 = vpop.f32.mrb[51].mxu0 }
 0x15a   :  { %v1943_v27 = vadd.f32 %v4384_v24, %v5779_v43  ;;  %v4387_v33 = vadd.f32 %v4386_v32, %v4385_v26  ;;  %v4444_v34 = vpop.f32.mrb[51].mxu1 }
 0x15b   :  { %v4445_v36 = vadd.f32 %v4444_v34, %v4443_v31 }
 0x15c   :  { %v5816_v38 = vadd.f32 %v4442_v37, %v1943_v27  ;;  %v1946_v29 = vadd.f32 %v4387_v33, %v5781_v45 }
 0x15e   :  { %v5819_v39 = vadd.f32 %v4445_v36, %v1946_v29  ;;  %v4388_v40 = vpop.f32.mrb[52].mxu0 }
 0x15f   :  { %v4446_v41 = vpop.f32.mrb[52].mxu1  ;;  %v4389_v49 = vpop.f32.mrb[53].mxu0 }
 0x160   :  { %v4390_v42 = vadd.f32 %v4389_v49, %v4388_v40  ;;  %v4447_v44 = vpop.f32.mrb[53].mxu1  ;;  %v4391_v46 = vpop.f32.mrb[54].mxu0 }
 0x161   :  { %v4448_v51 = vadd.f32 %v4447_v44, %v4446_v41  ;;  %v4449_v50 = vpop.f32.mrb[54].mxu1  ;;  %v4392_v52 = vpop.f32.mrb[55].mxu0 }
 0x162   :  { %v1951_v43 = vadd.f32 %v4390_v42, %v5783_v58  ;;  %v4450_v53 = vpop.f32.mrb[55].mxu1 }
 0x164   :  { %v5822_v54 = vadd.f32 %v4448_v51, %v1951_v43 }
 0x166   :  { %v4468_v55 = vpop.f32.mrb[56].mxu0 }
 0x167   :  { %v4526_v56 = vpop.f32.mrb[56].mxu1  ;;  %v4469_v57 = vpop.f32.mrb[57].mxu0 }
 0x168   :  { %v4470_v45 = vadd.f32 %v4469_v57, %v4468_v55  ;;  %v4527_v59 = vpop.f32.mrb[57].mxu1  ;;  %v4471_v60 = vpop.f32.mrb[58].mxu0 }
 0x169   :  { %v4528_v63 = vadd.f32 %v4527_v59, %v4526_v56  ;;  %v4529_v61 = vpop.f32.mrb[58].mxu1  ;;  %v4472_v62 = vpop.f32.mrb[59].mxu0 }
 0x16a   :  { %v2079_v0 = vadd.f32 %v4470_v45, %v5786_v10  ;;  %v4473_v1 = vadd.f32 %v4472_v62, %v4471_v60  ;;  %v4530_v4 = vpop.f32.mrb[59].mxu1 }
 0x16b   :  { %v4531_v5 = vadd.f32 %v4530_v4, %v4529_v61 }
 0x16c   :  { %v5825_v6 = vadd.f32 %v4528_v63, %v2079_v0  ;;  %v2082_v58 = vadd.f32 %v4473_v1, %v5789_v12 }
 0x16e   :  { %v5828_v7 = vadd.f32 %v4531_v5, %v2082_v58  ;;  %v4474_v8 = vpop.f32.mrb[60].mxu0 }
 0x16f   :  { %v4532_v9 = vpop.f32.mrb[60].mxu1  ;;  %v4475_v11 = vpop.f32.mrb[61].mxu0 }
 0x170   :  { %v4476_v14 = vadd.f32 %v4475_v11, %v4474_v8  ;;  %v4533_v16 = vpop.f32.mrb[61].mxu1  ;;  %v4477_v13 = vpop.f32.mrb[62].mxu0 }
 0x171   :  { %v4534_v17 = vadd.f32 %v4533_v16, %v4532_v9  ;;  %v4535_v18 = vpop.f32.mrb[62].mxu1  ;;  %v4478_v19 = vpop.f32.mrb[63].mxu0 }
 0x172   :  { %v2087_v10 = vadd.f32 %v4476_v14, %v5792_v28  ;;  %v4479_v15 = vadd.f32 %v4478_v19, %v4477_v13  ;;  %v4536_v22 = vpop.f32.mrb[63].mxu1 }
 0x173   :  { %v4537_v23 = vadd.f32 %v4536_v22, %v4535_v18 }
 0x174   :  { %v5831_v35 = vadd.f32 %v4534_v17, %v2087_v10  ;;  %v2090_v12 = vadd.f32 %v4479_v15, %v5795_v30 }
 0x176   :  { %v5834_v24 = vadd.f32 %v4537_v23, %v2090_v12  ;;  %v4480_v25 = vpop.f32.mrb[64].mxu0 }
 0x177   :  { %v4538_v26 = vpop.f32.mrb[64].mxu1  ;;  %v4481_v37 = vpop.f32.mrb[65].mxu0 }
 0x178   :  { %v4482_v31 = vadd.f32 %v4481_v37, %v4480_v25  ;;  %v4539_v32 = vpop.f32.mrb[65].mxu1  ;;  %v4483_v27 = vpop.f32.mrb[66].mxu0 }
 0x179   :  { %v4540_v33 = vadd.f32 %v4539_v32, %v4538_v26  ;;  %v4541_v34 = vpop.f32.mrb[66].mxu1  ;;  %v4484_v36 = vpop.f32.mrb[67].mxu0 }
 0x17a   :  { %v2095_v28 = vadd.f32 %v4482_v31, %v5798_v47  ;;  %v4485_v29 = vadd.f32 %v4484_v36, %v4483_v27  ;;  %v4542_v40 = vpop.f32.mrb[67].mxu1 }
 0x17b   :  { %v4543_v41 = vadd.f32 %v4542_v40, %v4541_v34 }
 0x17c   :  { %v5837_v49 = vadd.f32 %v4540_v33, %v2095_v28  ;;  %v2098_v30 = vadd.f32 %v4485_v29, %v5801_v48 }
 0x17e   :  { %v5840_v42 = vadd.f32 %v4543_v41, %v2098_v30  ;;  %v4486_v44 = vpop.f32.mrb[68].mxu0 }
 0x17f   :  { %v4544_v46 = vpop.f32.mrb[68].mxu1  ;;  %v4487_v51 = vpop.f32.mrb[69].mxu0 }
 0x180   :  { %v4488_v50 = vadd.f32 %v4487_v51, %v4486_v44  ;;  %v4545_v52 = vpop.f32.mrb[69].mxu1  ;;  %v4489_v43 = vpop.f32.mrb[70].mxu0 }
 0x181   :  { %v4546_v53 = vadd.f32 %v4545_v52, %v4544_v46  ;;  %v4547_v55 = vpop.f32.mrb[70].mxu1  ;;  %v4490_v56 = vpop.f32.mrb[71].mxu0 }
 0x182   :  { %v2103_v47 = vadd.f32 %v4488_v50, %v5804_v2  ;;  %v4491_v57 = vadd.f32 %v4490_v56, %v4489_v43  ;;  %v4548_v45 = vpop.f32.mrb[71].mxu1 }
 0x183   :  { %v4549_v59 = vadd.f32 %v4548_v45, %v4547_v55 }
 0x184   :  { %v5843_v60 = vadd.f32 %v4546_v53, %v2103_v47  ;;  %v2106_v48 = vadd.f32 %v4491_v57, %v5807_v3 }
 0x186   :  { %v5846_v63 = vadd.f32 %v4549_v59, %v2106_v48  ;;  %v4492_v61 = vpop.f32.mrb[72].mxu0  ;;  %v6417_v59 = vmov 0.0|0.0  }
 0x187   :  { %v4550_v62 = vpop.f32.mrb[72].mxu1  ;;  %v4493_v0 = vpop.f32.mrb[73].mxu0  ;;  %4753 = vmatprep.subr.bf16.mxu0 %v6417_v59 }
 0x188   :  { %v4494_v1 = vadd.f32 %v4493_v0, %v4492_v61  ;;  %v4551_v4 = vpop.f32.mrb[73].mxu1  ;;  %v4495_v5 = vpop.f32.mrb[74].mxu0 }
 0x189   :  { %v4552_v58 = vadd.f32 %v4551_v4, %v4550_v62  ;;  %v4553_v8 = vpop.f32.mrb[74].mxu1  ;;  %v4496_v9 = vpop.f32.mrb[75].mxu0  ;;  %v5015_v4 = vmov 1966171168  }
 0x18a   :  { %v2111_v2 = vadd.f32 %v4494_v1, %v5810_v20  ;;  %v4497_v11 = vadd.f32 %v4496_v9, %v4495_v5  ;;  %v4554_v14 = vpop.f32.mrb[75].mxu1  ;;  %v2531_v5 = vunpack.c.l.s4 %v5015_v4 }
 0x18b   :  { %v4555_v16 = vadd.f32 %v4554_v14, %v4553_v8 }
 0x18c   :  { %v5849_v13 = vadd.f32 %v4552_v58, %v2111_v2  ;;  %v2114_v3 = vadd.f32 %v4497_v11, %v5813_v21  ;;  %v2533_v58 = vlaneseq }
 0x18e   :  { %v5852_v17 = vadd.f32 %v4555_v16, %v2114_v3  ;;  %v4498_v18 = vpop.f32.mrb[76].mxu0 }
 0x18f   :  { %v4556_v19 = vpop.f32.mrb[76].mxu1  ;;  %v4499_v10 = vpop.f32.mrb[77].mxu0 }
 0x190   :  { %v4500_v15 = vadd.f32 %v4499_v10, %v4498_v18  ;;  %v4557_v22 = vpop.f32.mrb[77].mxu1  ;;  %v4501_v23 = vpop.f32.mrb[78].mxu0 }
 0x191   :  { %v4558_v12 = vadd.f32 %v4557_v22, %v4556_v19  ;;  %v4559_v25 = vpop.f32.mrb[78].mxu1  ;;  %v4502_v26 = vpop.f32.mrb[79].mxu0  ;;  %v2534_v22 = vshrl.u32 %v2533_v58, 7 }
 0x192   :  { %v2119_v20 = vadd.f32 %v4500_v15, %v5816_v38  ;;  %v4503_v37 = vadd.f32 %v4502_v26, %v4501_v23  ;;  %v4560_v31 = vpop.f32.mrb[79].mxu1  ;;  %v2532_v15 = vunpack.c.0.s8 %v2531_v5 }
 0x193   :  { %v4561_v32 = vadd.f32 %v4560_v31, %v4559_v25 }
 0x194   :  { %v5855_v27 = vadd.f32 %v4558_v12, %v2119_v20  ;;  %v2122_v21 = vadd.f32 %v4503_v37, %v5819_v39  ;;  %v5871_v37 = vsub.s32 %v2532_v15, %v2534_v22 }
 0x196   :  { %v5858_v33 = vadd.f32 %v4561_v32, %v2122_v21  ;;  %v4504_v34 = vpop.f32.mrb[80].mxu0 }
 0x197   :  { %v4562_v36 = vpop.f32.mrb[80].mxu1  ;;  %v4505_v28 = vpop.f32.mrb[81].mxu0 }
 0x198   :  { %v4506_v29 = vadd.f32 %v4505_v28, %v4504_v34  ;;  %v4563_v40 = vpop.f32.mrb[81].mxu1  ;;  %v4507_v41 = vpop.f32.mrb[82].mxu0 }
 0x199   :  { %v4564_v30 = vadd.f32 %v4563_v40, %v4562_v36  ;;  %v4565_v44 = vpop.f32.mrb[82].mxu1  ;;  %v4508_v46 = vpop.f32.mrb[83].mxu0 }
 0x19a   :  { %v2127_v38 = vadd.f32 %v4506_v29, %v5822_v54  ;;  %v4566_v51 = vpop.f32.mrb[83].mxu1 }
 0x19c   :  { %v5861_v50 = vadd.f32 %v4564_v30, %v2127_v38 }
 0x19e   :  { %v4584_v52 = vpop.f32.mrb[84].mxu0 }
 0x19f   :  { %v4642_v43 = vpop.f32.mrb[84].mxu1  ;;  %v4585_v53 = vpop.f32.mrb[85].mxu0 }
 0x1a0   :  { %v4586_v39 = vadd.f32 %v4585_v53, %v4584_v52  ;;  %v4643_v55 = vpop.f32.mrb[85].mxu1  ;;  %v4587_v56 = vpop.f32.mrb[86].mxu0 }
 0x1a1   :  { %v4644_v47 = vadd.f32 %v4643_v55, %v4642_v43  ;;  %v4645_v57 = vpop.f32.mrb[86].mxu1  ;;  %v4588_v45 = vpop.f32.mrb[87].mxu0 }
 0x1a2   :  { %v2255_v48 = vadd.f32 %v4586_v39, %v5825_v6  ;;  %v4589_v61 = vadd.f32 %v4588_v45, %v4587_v56  ;;  %v4646_v62 = vpop.f32.mrb[87].mxu1 }
 0x1a3   :  { %v4647_v54 = vadd.f32 %v4646_v62, %v4645_v57 }
 0x1a4   :  { %v2343_v0 = vadd.f32 %v4644_v47, %v2255_v48  ;;  %v2258_v1 = vadd.f32 %v4589_v61, %v5828_v7 }
 0x1a6   :  { %v2346_v8 = vadd.f32 %v4647_v54, %v2258_v1  ;;  %v4590_v9 = vpop.f32.mrb[88].mxu0  ;;  %v2529_v32 = vcombine.high %v2343_v0, %v2343_v0  ;;  %v2536_v44 = vrot.slane %v2343_v0, %v5871_v37 }
 0x1a7   :  { %v4648_v2 = vpop.f32.mrb[88].mxu1  ;;  %v4591_v11 = vpop.f32.mrb[89].mxu0 }
 0x1a8   :  { %v4649_v14 = vpop.f32.mrb[89].mxu1  ;;  %v4593_v16 = vpop.f32.mrb[90].mxu0  ;;  %v4592_v3 = vadd.f32 %v4591_v11, %v4590_v9  ;;  %v4792_v6 = vpack.i.bf16 %v2346_v8, %v2343_v0  ;;  %v2543_v51 = vrot.slane %v2529_v32, %v5871_v37  ;;  %v2578_v52 = vcombine.high %v2346_v8, %v2346_v8 }
 0x1a9   :  { %v4650_v18 = vadd.f32 %v4649_v14, %v4648_v2  ;;  %v4651_v19 = vpop.f32.mrb[90].mxu1  ;;  %v4594_v10 = vpop.f32.mrb[91].mxu0  ;;  %v2585_v53 = vrot.slane %v2346_v8, %v5871_v37  ;;  %v2544_v56 = vcombine.high %v2536_v44, %v2536_v44 }
 0x1aa   :  { %v4652_v23 = vpop.f32.mrb[91].mxu1  ;;  %v2263_v12 = vadd.f32 %v4592_v3, %v5831_v35  ;;  %v4595_v7 = vadd.f32 %v4594_v10, %v4593_v16  ;;  %4793 = vrot.lane.b32.xlu0 %v4792_v6, %s5016_s0  ;;  %v2545_v57 = vcombine.high %v2543_v51, %v2543_v51  ;;  %v2592_v45 = vrot.slane %v2578_v52, %v5871_v37 }
 0x1ab   :  { %v4653_v25 = vadd.f32 %v4652_v23, %v4651_v19  ;;  %v2593_v54 = vcombine.high %v2585_v53, %v2585_v53  ;;  %v2566_v9 = vrot.slane %v2544_v56, %v5871_v37  ;;  %v2552_v19 = vrot.slane %v2536_v44, %v5871_v37 }
 0x1ac   :  { %v5868_v26 = vadd.f32 %v4650_v18, %v2263_v12  ;;  %v2266_v20 = vadd.f32 %v4595_v7, %v5834_v24  ;;  %v2594_v2 = vcombine.high %v2592_v45, %v2592_v45  ;;  %v5890_v11 = vrot.slane %v2545_v57, %v5871_v37 }
 0x1ad   :  { %v5893_v14 = vrot.slane %v2593_v54, %v5871_v37  ;;  %v5898_v10 = vrot.slane %v2543_v51, %v5871_v37  ;;  %v5901_v6 = vrot.slane %v2585_v53, %v5871_v37 }
 0x1ae   :  { %v4596_v31 = vpop.f32.mrb[92].mxu0  ;;  %v5873_v36 = vadd.f32 %v4653_v25, %v2266_v20  ;;  %v2627_v15 = vcombine.high %v5868_v26, %v5868_v26  ;;  %v2634_v22 = vrot.slane %v5868_v26, %v5871_v37  ;;  %v5911_v25 = vrot.slane %v2592_v45, %v5871_v37 }
 0x1af   :  { %v4654_v21 = vpop.f32.mrb[92].mxu1  ;;  %v4597_v34 = vpop.f32.mrb[93].mxu0  ;;  %v5914_v20 = vrot.slane %v2594_v2, %v5871_v37 }
 0x1b0   :  { %v4598_v28 = vadd.f32 %v4597_v34, %v4596_v31  ;;  %v4655_v29 = vpop.f32.mrb[93].mxu1  ;;  %v4599_v35 = vpop.f32.mrb[94].mxu0  ;;  %v2676_v51 = vcombine.high %v5873_v36, %v5873_v36 }
 0x1b1   :  { %v4656_v40 = vadd.f32 %v4655_v29, %v4654_v21  ;;  %v4657_v41 = vpop.f32.mrb[94].mxu1  ;;  %v4600_v30 = vpop.f32.mrb[95].mxu0  ;;  %v3139_v21 = vcombine.low %v2552_v19, %v2566_v9 }
 0x1b2   :  { %v2271_v46 = vadd.f32 %v4598_v28, %v5837_v49  ;;  %v4601_v38 = vadd.f32 %v4600_v30, %v4599_v35  ;;  %v4658_v24 = vpop.f32.mrb[95].mxu1  ;;  %v4797_v49 = vpack.i.bf16 %v5873_v36, %v5868_v26  ;;  %v4205_v28 = vcombine.high %v2552_v19, %v2566_v9 }
 0x1b3   :  { %v4659_v43 = vadd.f32 %v4658_v24, %v4657_v41  ;;  %v2642_v24 = vcombine.high %v2634_v22, %v2634_v22 }
 0x1b4   :  { %v5879_v39 = vadd.f32 %v4656_v40, %v2271_v46  ;;  %v2274_v55 = vadd.f32 %v4601_v38, %v5840_v42  ;;  %4798 = vrot.lane.b32.xlu0 %v4797_v49, %s5016_s0  ;;  %v5924_v40 = vrot.slane %v2627_v15, %v5871_v37  ;;  %v5933_v49 = vrot.slane %v2634_v22, %v5871_v37 }
 0x1b5   :  { %v5957_v9 = vrot.slane %v2642_v24, %v5871_v37 }
 0x1b6   :  { %v4602_v47 = vpop.f32.mrb[96].mxu0  ;;  %v5883_v48 = vadd.f32 %v4659_v43, %v2274_v55 }
 0x1b7   :  { %v4660_v61 = vpop.f32.mrb[96].mxu1  ;;  %v4603_v62 = vpop.f32.mrb[97].mxu0 }
 0x1b8   :  { %v4661_v0 = vpop.f32.mrb[97].mxu1  ;;  %v4605_v1 = vpop.f32.mrb[98].mxu0  ;;  %v4604_v42 = vadd.f32 %v4603_v62, %v4602_v47  ;;  %v5939_v62 = vrot.slane %v4205_v28, %v5871_v37 }
 0x1b9   :  { %v4663_v4 = vpop.f32.mrb[98].mxu1  ;;  %v4606_v5 = vpop.f32.mrb[99].mxu0  ;;  %v4662_v58 = vadd.f32 %v4661_v0, %v4660_v61  ;;  %v5936_v61 = vrot.slane %v3139_v21, %v5871_v37  ;;  %v5945_v0 = vrot.slane %v5873_v36, %v5871_v37  ;;  %v5960_v36 = vrot.slane %v2676_v51, %v5871_v37 }
 0x1ba   :  { %v4664_v8 = vpop.f32.mrb[99].mxu1  ;;  %v2279_v16 = vadd.f32 %v4604_v42, %v5843_v60  ;;  %v4607_v3 = vadd.f32 %v4606_v5, %v4605_v1  ;;  %v4802_v60 = vpack.i.bf16 %v5883_v48, %v5879_v39 }
 0x1bb   :  { %v4665_v18 = vadd.f32 %v4664_v8, %v4663_v4  ;;  %v5952_v4 = vrot.slane %v5924_v40, %v5871_v37 }
 0x1bc   :  { %v2367_v23 = vadd.f32 %v4662_v58, %v2279_v16  ;;  %v2282_v12 = vadd.f32 %v4607_v3, %v5846_v63  ;;  %4803 = vrot.lane.b32.xlu1 %v4802_v60, %s5016_s0 }
 0x1be   :  { %v4608_v7 = vpop.f32.mrb[100].mxu0  ;;  %v2370_v41 = vadd.f32 %v4665_v18, %v2282_v12  ;;  %v2823_v52 = vcombine.high %v2367_v23, %v2367_v23  ;;  %v2830_v55 = vrot.slane %v2367_v23, %v5871_v37 }
 0x1bf   :  { %v4666_v31 = vpop.f32.mrb[100].mxu1  ;;  %v4609_v32 = vpop.f32.mrb[101].mxu0 }
 0x1c0   :  { %v4667_v26 = vpop.f32.mrb[101].mxu1  ;;  %v4611_v63 = vpop.f32.mrb[102].mxu0  ;;  %v4610_v30 = vadd.f32 %v4609_v32, %v4608_v7  ;;  %v2872_v56 = vcombine.high %v2370_v41, %v2370_v41  ;;  %v2837_v5 = vrot.slane %v2823_v52, %v5871_v37  ;;  %v4807_v58 = vpack.i.bf16 %v2370_v41, %v2367_v23 }
 0x1c1   :  { %v4668_v44 = vadd.f32 %v4667_v26, %v4666_v31  ;;  %v4669_v46 = vpop.f32.mrb[102].mxu1  ;;  %v4612_v38 = vpop.f32.mrb[103].mxu0  ;;  %v2838_v2 = vcombine.high %v2830_v55, %v2830_v55  ;;  %v5972_v60 = vrot.slane %v2830_v55, %v5871_v37  ;;  %v2879_v7 = vrot.slane %v2370_v41, %v5871_v37 }
 0x1c2   :  { %v4613_v43 = vadd.f32 %v4612_v38, %v4611_v63  ;;  %v4670_v53 = vpop.f32.mrb[103].mxu1  ;;  %v2287_v47 = vadd.f32 %v4610_v30, %v5849_v13  ;;  %v2886_v13 = vrot.slane %v2872_v56, %v5871_v37  ;;  %4808 = vrot.lane.b32.xlu1 %v4807_v58, %s5016_s0  ;;  %v2839_v63 = vcombine.high %v2837_v5, %v2837_v5 }
 0x1c3   :  { %v4671_v57 = vadd.f32 %v4670_v53, %v4669_v46  ;;  %6420 = vst [vmem:[#allocation8_spill] sm:$0xff] %v5972_v60  ;;  %v5998_v53 = vrot.slane %v2838_v2, %v5871_v37  ;;  %v2868_v56 = vcombine.high %v5972_v60, %v5972_v60 }
 0x1c4   :  { %v5948_v1 = vadd.f32 %v4668_v44, %v2287_v47  ;;  %v2290_v42 = vadd.f32 %v4613_v43, %v5852_v17  ;;  %v2888_v16 = vcombine.high %v2886_v13, %v2886_v13  ;;  %v5995_v43 = vrot.slane %v2837_v5, %v5871_v37 }
 0x1c5   :  { %v2887_v47 = vcombine.high %v2879_v7, %v2879_v7  ;;  %v6013_v2 = vrot.slane %v2839_v63, %v5871_v37 }
 0x1c6   :  { %v4614_v8 = vpop.f32.mrb[104].mxu0  ;;  %v2921_v19 = vcombine.high %v5948_v1, %v5948_v1  ;;  %v5966_v15 = vrot.slane %v5948_v1, %v5871_v37  ;;  %v5968_v17 = vadd.f32 %v4671_v57, %v2290_v42  ;;  %v5976_v31 = vrot.slane %v2888_v16, %v5871_v37 }
 0x1c7   :  { %v4672_v3 = vpop.f32.mrb[104].mxu1  ;;  %v4615_v18 = vpop.f32.mrb[105].mxu0  ;;  %v6007_v42 = vrot.slane %v2879_v7, %v5871_v37  ;;  %v6016_v16 = vrot.slane %v2886_v13, %v5871_v37  ;;  %v2869_v59 = vcombine.high %v5995_v43, %v5995_v43 }
 0x1c8   :  { %v4616_v22 = vadd.f32 %v4615_v18, %v4614_v8  ;;  %v4673_v23 = vpop.f32.mrb[105].mxu1  ;;  %v4617_v12 = vpop.f32.mrb[106].mxu0  ;;  %v2935_v28 = vrot.slane %v2921_v19, %v5871_v37  ;;  %v5981_v30 = vrot.slane %v5966_v15, %v5871_v37  ;;  %v2970_v44 = vcombine.high %v5968_v17, %v5968_v17 }
 0x1c9   :  { %v4674_v32 = vadd.f32 %v4673_v23, %v4672_v3  ;;  %v4675_v21 = vpop.f32.mrb[106].mxu1  ;;  %v4618_v26 = vpop.f32.mrb[107].mxu0  ;;  %v2920_v41 = vcombine.high %v5976_v31, %v5976_v31  ;;  %v5989_v38 = vrot.slane %v5968_v17, %v5871_v37  ;;  %v2936_v3 = vcombine.high %v5966_v15, %v5966_v15 }
 0x1ca   :  { %v4676_v46 = vpop.f32.mrb[107].mxu1  ;;  %v2295_v24 = vadd.f32 %v4616_v22, %v5855_v27  ;;  %v4619_v51 = vadd.f32 %v4618_v26, %v4617_v12  ;;  %v2937_v55 = vcombine.high %v2935_v28, %v2935_v28  ;;  %v2984_v27 = vrot.slane %v2970_v44, %v5871_v37 }
 0x1cb   :  { %v6003_v57 = vcombine.low %v2920_v41, %v5981_v30  ;;  %v6022_v19 = vrot.slane %v5989_v38, %v5871_v37  ;;  %v2909_v15 = vrot.slane %v2887_v47, %v5871_v37  ;;  %v4677_v41 = vadd.f32 %v4676_v46, %v4675_v21 }
 0x1cc   :  { %v6010_v58 = vrot.slane %v2937_v55, %v5871_v37  ;;  %v2383_v5 = vadd.f32 %v4674_v32, %v2295_v24  ;;  %v2986_v18 = vcombine.high %v2984_v27, %v2984_v27  ;;  %v2298_v13 = vadd.f32 %v4619_v51, %v5858_v33 }
 0x1cd   :  { %v2917_v45 = vcombine.high %v6007_v42, %v6007_v42  ;;  %v3527_v54 = vrot.slane %v6003_v57, %v5871_v37 }
 0x1ce   :  { %v4620_v8 = vpop.f32.mrb[108].mxu0  ;;  %v2969_v12 = vcombine.high %v6010_v58, %v6010_v58  ;;  %v3019_v7 = vcombine.high %v2383_v5, %v2383_v5  ;;  %v6027_v32 = vrot.slane %v2383_v5, %v5871_v37  ;;  %v6032_v44 = vrot.slane %v2986_v18, %v5871_v37 }
 0x1cf   :  { %v4621_v22 = vpop.f32.mrb[109].mxu0  ;;  %v4678_v23 = vpop.f32.mrb[108].mxu1  ;;  %v2386_v46 = vadd.f32 %v4677_v41, %v2298_v13  ;;  %v4812_v18 = vpack.i.bf16 %v5968_v17, %v5948_v1  ;;  %v2919_v17 = vcombine.high %v2909_v15, %v2909_v15 }
 0x1d0   :  { %v4679_v26 = vpop.f32.mrb[109].mxu1  ;;  %v4623_v63 = vpop.f32.mrb[110].mxu0  ;;  %v6039_v34 = vcombine.low %v2969_v12, %v6022_v19  ;;  %v3033_v33 = vrot.slane %v3019_v7, %v5871_v37  ;;  %v6044_v51 = vrot.slane %v6027_v32, %v5871_v37  ;;  %v3018_v21 = vcombine.high %v6032_v44, %v6032_v44 }
 0x1d1   :  { %v4624_v24 = vpop.f32.mrb[111].mxu0  ;;  %v4681_v55 = vpop.f32.mrb[110].mxu1  ;;  %v4622_v63 = vadd.f32 %v4621_v22, %v4620_v8  ;;  %v2951_v12 = vrot.slane %v2935_v28, %v5871_v37  ;;  %v2958_v7 = vrot.slane %v2936_v3, %v5871_v37  ;;  %v6058_v29 = vrot.slane %v2386_v46, %v5871_v37  ;;  %4813 = vrot.lane.b32.xlu0 %v4812_v18, %s5016_s0 }
 0x1d2   :  { %v4682_v47 = vpop.f32.mrb[111].mxu1  ;;  %v2918_v24 = vcombine.high %v6016_v16, %v6016_v16  ;;  %v3035_v55 = vcombine.high %v3033_v33, %v3033_v33  ;;  %v6055_v35 = vcombine.low %v3018_v21, %v6044_v51  ;;  %v2985_v8 = vcombine.high %v5989_v38, %v5989_v38 }
 0x1d3   :  { %v3068_v47 = vcombine.high %v2386_v46, %v2386_v46  ;;  %v2303_v1 = vadd.f32 %v4622_v63, %v5861_v50  ;;  %v4680_v3 = vadd.f32 %v4679_v26, %v4678_v23  ;;  %v6068_v22 = vrot.slane %v2984_v27, %v5871_v37 }
 0x1d4   :  { %v6065_v28 = vrot.slane %v3035_v55, %v5871_v37  ;;  %v6075_v41 = vrot.slane %v6058_v29, %v5871_v37  ;;  %v4817_v21 = vpack.i.bf16 %v2386_v46, %v2383_v5  ;;  %v2870_v38 = vcombine.high %v5998_v53, %v5998_v53 }
 0x1d5   :  { %v6071_v13 = vrot.slane %v3068_v47, %v5871_v37  ;;  %v2391_v18 = vadd.f32 %v4680_v3, %v2303_v1  ;;  %v2871_v23 = vcombine.high %v6013_v2, %v6013_v2  ;;  %v2966_v27 = vcombine.high %v5981_v30, %v5981_v30 }
 0x1d6   :  { %v3067_v50 = vcombine.high %v6065_v28, %v6065_v28  ;;  %v2967_v26 = vcombine.high %v2951_v12, %v2951_v12  ;;  %v2968_v63 = vcombine.high %v2958_v7, %v2958_v7  ;;  %4818 = vrot.lane.b32.xlu1 %v4817_v21, %s5016_s0  ;;  %v3447_v30 = vcombine.low %v5998_v53, %v2868_v56 }
 0x1d7   :  { %v3084_v55 = vcombine.high %v6071_v13, %v6071_v13  ;;  %v6092_v46 = vrot.slane %v2391_v18, %v5871_v37  ;;  %2435 = vrot.lane.b32.xlu0 %v2391_v18, %s5016_s0  ;;  %v3448_v47 = vcombine.low %v2870_v38, %v5995_v43  ;;  %v3007_v1 = vrot.slane %v2985_v8, %v5871_v37 }
 0x1d8   :  { %v6089_v5 = vcombine.low %v3067_v50, %v6075_v41  ;;  %v3015_v3 = vcombine.high %v6022_v19, %v6022_v19  ;;  %v3449_v50 = vcombine.low %v6013_v2, %v2869_v59  ;;  %v3016_v18 = vcombine.high %v6068_v22, %v6068_v22 }
 0x1d9   :  { %v6104_v21 = vrot.slane %v3084_v55, %v5871_v37  ;;  %v3131_v52 = vrot.slane %v6092_v46, %v5871_v37  ;;  %v3450_v53 = vcombine.low %v2871_v23, %v6007_v42  ;;  %v3457_v43 = vrot.slane %v3447_v30, %v5871_v37 }
 0x1da   :  { %v3464_v19 = vrot.slane %v3448_v47, %v5871_v37  ;;  %v3471_v8 = vrot.slane %v3449_v50, %v5871_v37  ;;  %v3496_v38 = vcombine.low %v2909_v15, %v2917_v45  ;;  %v3497_v2 = vcombine.low %v2919_v17, %v6016_v16 }
 0x1db   :  { %v3116_v56 = vcombine.high %v6104_v21, %v6104_v21  ;;  %v3478_v59 = vrot.slane %v3450_v53, %v5871_v37  ;;  %v3498_v55 = vcombine.low %v5976_v31, %v2918_v24  ;;  %v3017_v42 = vcombine.high %v3007_v1, %v3007_v1 }
 0x1dc   :  { %v3034_v23 = vcombine.high %v6027_v32, %v6027_v32  ;;  %v3479_v60 = vcombine.low %v3457_v43, %v3464_v19  ;;  %v3506_v50 = vrot.slane %v3496_v38, %v5871_v37  ;;  %v3513_v45 = vrot.slane %v3497_v2, %v5871_v37 }
 0x1dd   :  { %v6124_v30 = vcombine.low %v3116_v56, %v3131_v52  ;;  %v3480_v47 = vcombine.low %v3471_v8, %v3478_v59  ;;  %v3520_v15 = vrot.slane %v3498_v55, %v5871_v37  ;;  %v3049_v16 = vrot.slane %v3033_v33, %v5871_v37 }
 0x1de   :  { %v3545_v31 = vcombine.low %v2958_v7, %v2966_v27  ;;  %v3546_v24 = vcombine.low %v2968_v63, %v2951_v12  ;;  %v3547_v57 = vcombine.low %v6010_v58, %v2967_v26  ;;  %v3487_v17 = vrot.slane %v3479_v60, %v5871_v37 }
 0x1df   :  { %v3494_v32 = vrot.slane %v3480_v47, %v5871_v37  ;;  %v3528_v52 = vcombine.low %v3506_v50, %v3513_v45  ;;  %v3529_v53 = vcombine.low %v3520_v15, %v3527_v54  ;;  %v3576_v8 = vrot.slane %v6039_v34, %v5871_v37 }
 0x1e0   :  { %v3555_v43 = vrot.slane %v3545_v31, %v5871_v37  ;;  %v3562_v56 = vrot.slane %v3546_v24, %v5871_v37  ;;  %v3569_v19 = vrot.slane %v3547_v57, %v5871_v37  ;;  %v3056_v33 = vrot.slane %v3034_v23, %v5871_v37 }
 0x1e1   :  { %v6139_v12 = vcombine.low %v3487_v17, %v3494_v32  ;;  %v3536_v58 = vrot.slane %v3528_v52, %v5871_v37  ;;  %v3543_v60 = vrot.slane %v3529_v53, %v5871_v37  ;;  %v6145_v54 = vrot.slane %v5945_v0, %v5871_v37 }
 0x1e2   :  { %v3083_v7 = vcombine.high %v6058_v29, %v6058_v29  ;;  %v3577_v27 = vcombine.low %v3555_v43, %v3562_v56  ;;  %v3578_v26 = vcombine.low %v3569_v19, %v3576_v8  ;;  %v6421_v34 = vcombine.high %v5924_v40, %v5924_v40 }
 0x1e3   :  { %v3237_v38 = vcombine.low %v5933_v49, %v5957_v9  ;;  %v6157_v59 = vcombine.low %v3536_v58, %v3543_v60  ;;  %v3594_v2 = vcombine.low %v3007_v1, %v3015_v3  ;;  %v3064_v55 = vcombine.high %v6044_v51, %v6044_v51 }
 0x1e4   :  { %v6153_v63 = vrot.slane %v6421_v34, %v5871_v37  ;;  %v3585_v23 = vrot.slane %v3577_v27, %v5871_v37  ;;  %v3592_v29 = vrot.slane %v3578_v26, %v5871_v37  ;;  %v3595_v47 = vcombine.low %v3017_v42, %v6068_v22 }
 0x1e5   :  { %v3065_v50 = vcombine.high %v3049_v16, %v3049_v16  ;;  %v3066_v45 = vcombine.high %v3056_v33, %v3056_v33  ;;  %v3596_v40 = vcombine.low %v6032_v44, %v3016_v18  ;;  %v3625_v15 = vrot.slane %v6055_v35, %v5871_v37 }
 0x1e6   :  { %v3105_v31 = vrot.slane %v3083_v7, %v5871_v37  ;;  %v6168_v24 = vcombine.low %v3585_v23, %v3592_v29  ;;  %v3604_v1 = vrot.slane %v3594_v2, %v5871_v37  ;;  %v3611_v51 = vrot.slane %v3595_v47, %v5871_v37 }
 0x1e7   :  { %v4209_v3 = vcombine.high %v5933_v49, %v5957_v9  ;;  %v2692_v22 = vcombine.high %v5960_v36, %v5960_v36  ;;  %v6178_v44 = vrot.slane %v5960_v36, %v5871_v37  ;;  %v3618_v35 = vrot.slane %v3596_v40, %v5871_v37 }
 0x1e8   :  { %v6422_v18 = vcombine.high %v5945_v0, %v5945_v0  ;;  %v3098_v57 = vrot.slane %v6071_v13, %v5871_v37  ;;  %v3626_v17 = vcombine.low %v3604_v1, %v3611_v51  ;;  %v3643_v32 = vcombine.low %v3056_v33, %v3064_v55 }
 0x1e9   :  { %v2725_v52 = vcombine.high %v5879_v39, %v5879_v39  ;;  %v2732_v36 = vrot.slane %v5879_v39, %v5871_v37  ;;  %v3627_v53 = vcombine.low %v3618_v35, %v3625_v15  ;;  %v3644_v43 = vcombine.low %v3066_v45, %v3049_v16 }
 0x1ea   :  { %v6185_v42 = vrot.slane %v6422_v18, %v5871_v37  ;;  %v3113_v56 = vcombine.high %v6075_v41, %v6075_v41  ;;  %v3115_v19 = vcombine.high %v3105_v31, %v3105_v31  ;;  %v3634_v0 = vrot.slane %v3626_v17, %v5871_v37 }
 0x1eb   :  { %v3645_v8 = vcombine.low %v6065_v28, %v3065_v50  ;;  %v3641_v13 = vrot.slane %v3627_v53, %v5871_v37  ;;  %v3653_v33 = vrot.slane %v3643_v32, %v5871_v37  ;;  %v3660_v58 = vrot.slane %v3644_v43, %v5871_v37 }
 0x1ec   :  { %v3674_v60 = vrot.slane %v6089_v5, %v5871_v37  ;;  %v6203_v39 = vrot.slane %v2692_v22, %v5871_v37  ;;  %v3114_v16 = vcombine.high %v3098_v57, %v3098_v57  ;;  %v6423_v41 = vcombine.low %v5898_v10, %v5890_v11 }
 0x1ed   :  { %v3667_v28 = vrot.slane %v3645_v8, %v5871_v37  ;;  %v3286_v27 = vcombine.low %v6145_v54, %v6185_v42  ;;  %v2739_v26 = vrot.slane %v2725_v52, %v5871_v37  ;;  %v6213_v34 = vcombine.low %v3634_v0, %v3641_v13 }
 0x1ee   :  { %v3163_v7 = vrot.slane %v6423_v41, %v5871_v37  ;;  %v3675_v2 = vcombine.low %v3653_v33, %v3660_v58  ;;  %v4211_v5 = vcombine.high %v6145_v54, %v6185_v42  ;;  %v2774_v55 = vcombine.high %v5883_v48, %v5883_v48  ;;  %v3835_v41 = vld [vmem:[%s6411_s2 + $0x10] sm:$0xff] }
 0x1ef   :  { %v6424_v23 = vcombine.high %v5898_v10, %v5890_v11  ;;  %v3676_v47 = vcombine.low %v3667_v28, %v3674_v60  ;;  %v3190_v50 = vcombine.low %v5911_v25, %v5914_v20  ;;  %v4208_v45 = vcombine.high %v5911_v25, %v5914_v20 }
 0x1f0   :  { %v3692_v40 = vcombine.low %v3105_v31, %v3113_v56  ;;  %v3693_v15 = vcombine.low %v3115_v19, %v3098_v57  ;;  %v2740_v1 = vcombine.high %v2732_v36, %v2732_v36  ;;  %v3683_v51 = vrot.slane %v3675_v2, %v5871_v37 }
 0x1f1   :  { %v3170_v29 = vrot.slane %v6424_v23, %v5871_v37  ;;  %v3690_v22 = vrot.slane %v3676_v47, %v5871_v37  ;;  %v3694_v35 = vcombine.low %v6104_v21, %v3114_v16  ;;  %v2741_v18 = vcombine.high %v2739_v26, %v2739_v26 }
 0x1f2   :  { %v3702_v11 = vrot.slane %v3692_v40, %v5871_v37  ;;  %v3709_v10 = vrot.slane %v3693_v15, %v5871_v37  ;;  %v3723_v17 = vrot.slane %v6124_v30, %v5871_v37  ;;  %v6235_v32 = vrot.slane %v2774_v55, %v5871_v37  ;;  %v3838_v15 = vld [vmem:[%s6411_s2 + $0x28] sm:$0xff] }
 0x1f3   :  { %v3172_v25 = vcombine.low %v3163_v7, %v3170_v29  ;;  %v6237_v20 = vcombine.low %v3683_v51, %v3690_v22  ;;  %v3716_v31 = vrot.slane %v3694_v35, %v5871_v37  ;;  %v3212_v57 = vrot.slane %v3190_v50, %v5871_v37  ;;  %v3836_v7 = vld [vmem:[%s6411_s2 + $0x18] sm:$0xff] }
 0x1f4   :  { %v3219_v21 = vrot.slane %v4208_v45, %v5871_v37  ;;  %v3239_v52 = vcombine.low %v5952_v4, %v6153_v63  ;;  %v3724_v53 = vcombine.low %v3702_v11, %v3709_v10  ;;  %v6245_v43 = vrot.slane %v2732_v36, %v5871_v37 }
 0x1f5   :  { %v2781_v30 = vrot.slane %v5883_v48, %v5871_v37  ;;  %v4210_v56 = vcombine.high %v5952_v4, %v6153_v63  ;;  %v3725_v19 = vcombine.low %v3716_v31, %v3723_v17  ;;  %v2755_v0 = vrot.slane %v2739_v26, %v5871_v37  ;;  %3801 = vxpose.xlu0.b32.start [1/7] (short) (narrow) %v6139_v12, 8 }
 0x1f6   :  { %v3171_v8 = vcombine.low %v5936_v61, %v5939_v62  ;;  %v6425_v13 = vcombine.low %v5901_v6, %v5893_v14  ;;  %v6426_v48 = vcombine.high %v5901_v6, %v5893_v14  ;;  %v6264_v4 = vrot.slane %v2740_v1, %v5871_v37  ;;  %v3833_v61 = vld [vmem:[%s6411_s2] sm:$0xff]  ;;  %v3834_v62 = vld [vmem:[%s6411_s2 + $0x8] sm:$0xff] }
 0x1f7   :  { %v2769_v63 = vrot.slane %v2741_v18, %v5871_v37  ;;  %v3732_v12 = vrot.slane %v3724_v53, %v5871_v37  ;;  %v3739_v58 = vrot.slane %v3725_v19, %v5871_v37  ;;  %v2790_v14 = vcombine.high %v6235_v32, %v6235_v32  ;;  %v3839_v19 = vld [vmem:[%s6411_s2 + $0x30] sm:$0x1] }
 0x1f8   :  { %v3198_v36 = vrot.slane %v6425_v13, %v5871_v37  ;;  %v3205_v33 = vrot.slane %v6426_v48, %v5871_v37  ;;  %v3186_v6 = vrot.slane %v3172_v25, %v5871_v37  ;;  %v3221_v60 = vcombine.low %v3212_v57, %v3219_v21 }
 0x1f9   :  { %v3261_v16 = vrot.slane %v3239_v52, %v5871_v37  ;;  %v3268_v28 = vrot.slane %v4210_v56, %v5871_v37  ;;  %v3288_v26 = vcombine.low %v6178_v44, %v6203_v39  ;;  %v4212_v2 = vcombine.high %v6178_v44, %v6203_v39  ;;  %3802 = vxpose.xlu0.b32.cont [2/7] (short) (narrow) %v6157_v59, 8  ;;  %v3837_v59 = vld [vmem:[%s6411_s2 + $0x20] sm:$0xff] }
 0x1fa   :  { %v6290_v55 = vcombine.low %v3732_v12, %v3739_v58  ;;  %v2789_v23 = vcombine.high %v2781_v30, %v2781_v30  ;;  %v3179_v29 = vrot.slane %v3171_v8, %v5871_v37  ;;  %v3220_v47 = vcombine.low %v3198_v36, %v3205_v33 }
 0x1fb   :  { %v4771_v50 = vpack.c.bf16 %v3834_v62, %v3833_v61  ;;  %v6295_v45 = vrot.slane %v2781_v30, %v5871_v37  ;;  %v3247_v40 = vrot.slane %v3237_v38, %v5871_v37  ;;  %v3254_v44 = vrot.slane %v4209_v3, %v5871_v37 }
 0x1fc   :  { %v4775_v39 = vpack.c.bf16 %v3836_v7, %v3835_v41  ;;  %v3335_v1 = vcombine.low %v6245_v43, %v6264_v4  ;;  %v2818_v51 = vrot.slane %v2790_v14, %v5871_v37  ;;  %v3187_v38 = vcombine.low %v3179_v29, %v3186_v6 }
 0x1fd   :  { %v3235_v22 = vrot.slane %v3221_v60, %v5871_v37  ;;  %4772 = vmatprep.subr.bf16.mxu1 %v4771_v50  ;;  %v3270_v49 = vcombine.low %v3261_v16, %v3268_v28  ;;  %v3310_v9 = vrot.slane %v3288_v26, %v5871_v37  ;;  %v3317_v3 = vrot.slane %v4212_v2, %v5871_v37 }
 0x1fe   :  { %v3337_v35 = vcombine.low %v2755_v0, %v2769_v63  ;;  %4774 = vmatpush3.bf16.msra.mxu1 %v4771_v50  ;;  %3803 = vxpose.xlu0.b32.cont [3/7] (short) (narrow) %v6168_v24, 8  ;;  %v3228_v18 = vrot.slane %v3220_v47, %v5871_v37  ;;  %v4214_v11 = vcombine.high %v2755_v0, %v2769_v63  ;;  %v5018_v0 = vmov 0.0   ;;  %v6427_v47 = vld [vmem:[#allocation8_spill] sm:$0xff] }
 0x1ff   :  { %4776 = vmatprep.subr.bf16.mxu1 %v4775_v39  ;;  %v4779_v10 = vpack.c.bf16 %v3838_v15, %v3837_v59  ;;  %v2811_v17 = vrot.slane %v2789_v23, %v5871_v37  ;;  %v3269_v25 = vcombine.low %v3247_v40, %v3254_v44  ;;  %v3296_v31 = vrot.slane %v3286_v27, %v5871_v37 }
 0x200   :  { %v3303_v57 = vrot.slane %v4211_v5, %v5871_v37  ;;  %v4213_v24 = vcombine.high %v6245_v43, %v6264_v4  ;;  %v2804_v21 = vrot.slane %v6235_v32, %v5871_v37  ;;  %v3124_v52 = vcombine.high %v6092_v46, %v6092_v46  ;;  %3769 = vxpose.xlu1.b32.start [1/7] (short) (narrow) %v3187_v38, 8 }
 0x201   :  { %v3236_v53 = vcombine.low %v3228_v18, %v3235_v22  ;;  %v3284_v30 = vrot.slane %v3270_v49, %v5871_v37  ;;  %v3319_v56 = vcombine.low %v3310_v9, %v3317_v3  ;;  %v3359_v27 = vrot.slane %v3337_v35, %v5871_v37  ;;  %4733 = vmatprep.mubr.msk.f32.mxu0 %vm5017_vm1, %v5018_v0 }
 0x202   :  { %4778 = vmatpush3.bf16.msra.mxu1 %v4775_v39  ;;  %3804 = vxpose.xlu0.b32.cont [4/7] (short) (narrow) %v6213_v34, 8  ;;  %v3366_v54 = vrot.slane %v4214_v11, %v5871_v37  ;;  %v3386_v42 = vcombine.low %v2804_v21, %v2818_v51  ;;  %v4216_v5 = vcombine.high %v2804_v21, %v2818_v51  ;;  %v6428_v59 = vmov 0.0|0.0  }
 0x203   :  { %4780 = vmatprep.subr.bf16.mxu1 %v4779_v10  ;;  %v3384_v32 = vcombine.low %v6295_v45, %v2811_v17  ;;  %v3277_v43 = vrot.slane %v3269_v25, %v5871_v37  ;;  %v3318_v46 = vcombine.low %v3296_v31, %v3303_v57  ;;  %v4215_v34 = vcombine.high %v6295_v45, %v2811_v17 }
 0x204   :  { %3770 = vxpose.xlu1.b32.cont [2/7] (short) (narrow) %v3236_v53, 8  ;;  %v3345_v8 = vrot.slane %v3335_v1, %v5871_v37  ;;  %v3352_v13 = vrot.slane %v4213_v24, %v5871_v37  ;;  %v3138_v36 = vrot.slane %v3124_v52, %v5871_v37  ;;  %v3333_v33 = vrot.slane %v3319_v56, %v5871_v37  ;;  %v2396_v53 = vld [vmem:[%s6414_s5] sm:$0x3]  ;;  %s4966_s5 = scalar_lea.vmem %s3952_s20, 32 }
 0x205   :  { %v3285_v48 = vcombine.low %v3277_v43, %v3284_v30  ;;  %v3368_v4 = vcombine.low %v3359_v27, %v3366_v54  ;;  %v3408_v63 = vrot.slane %v3386_v42, %v5871_v37  ;;  %v3415_v12 = vrot.slane %v4216_v5, %v5871_v37  ;;  %v2397_v54 = vld [vmem:[%s6413_s4] sm:$0x3]  ;;  %p4967_p0 = scmp.ne.s32.totalorder %s3952_s20, %s4966_s5  ;;  %p4972_p2 = scmp.lt.s32.totalorder %s4966_s5, %s4966_s5 }
 0x206   :  { %4782 = vmatpush3.bf16.msra.mxu1 %v4779_v10  ;;  %3805 = vxpose.xlu0.b32.cont [5/7] (short) (narrow) %v6237_v20, 8  ;;  %v3326_v58 = vrot.slane %v3318_v46, %v5871_v37  ;;  %v3367_v61 = vcombine.low %v3345_v8, %v3352_v13  ;;  %v3747_v62 = vrot.slane %v3138_v36, %v5871_v37 }
 0x207   :  { %4748 = vmatprep.subr.msk.mxu1 %vm3849_vm0, %v3839_v19  ;;  %v3394_v14 = vrot.slane %v3384_v32, %v5871_v37  ;;  %v3401_v6 = vrot.slane %v4215_v34, %v5871_v37  ;;  %v3382_v60 = vrot.slane %v3368_v4, %v5871_v37  ;;  %v3417_v16 = vcombine.low %v3408_v63, %v3415_v12  ;;  %p4973_p3 = por %p4972_p2, %p4971_p1 }
 0x208   :  { %3771 = vxpose.xlu1.b32.cont [3/7] (short) (narrow) %v3285_v48, 8  ;;  %v3334_v20 = vcombine.low %v3326_v58, %v3333_v33  ;;  %v3375_v41 = vrot.slane %v3367_v61, %v5871_v37  ;;  %v3754_v7 = vrot.slane %v3747_v62, %v5871_v37 }
 0x209   :  { %v3416_v28 = vcombine.low %v3394_v14, %v3401_v6  ;;  %v3431_v2 = vrot.slane %v3417_v16, %v5871_v37  ;;  %p4974_p4 = pnand %p4973_p3, %p4967_p0 }
 0x20a   :  { %4749 = vmatpush3.msk.msra.mxu1 %vm3849_vm0, %v3839_v19  ;;  %3806 = vxpose.xlu0.b32.cont [6/7] (short) (narrow) %v6290_v55, 8  ;;  %v3383_v26 = vcombine.low %v3375_v41, %v3382_v60  ;;  %v3439_v55 = vrot.slane %v6427_v47, %v5871_v37 }
 0x20b   :  { %v3424_v23 = vrot.slane %v3416_v28, %v5871_v37 }
 0x20c   :  { %3772 = vxpose.xlu1.b32.cont [4/7] (short) (narrow) %v3334_v20, 8  ;;  %v3446_v50 = vrot.slane %v3439_v55, %v5871_v37 }
 0x20d   :  { %v3432_v29 = vcombine.low %v3424_v23, %v3431_v2 }
 0x20e   :  { %3807 = vxpose.xlu0.b32.end [7/7] (short) (narrow) %v3754_v7, 8 }
 0x210   :  { %3773 = vxpose.xlu1.b32.cont [5/7] (short) (narrow) %v3383_v26, 8 }
 0x214   :  { %3774 = vxpose.xlu1.b32.cont [6/7] (short) (narrow) %v3432_v29, 8 }
 0x218   :  { %3775 = vxpose.xlu1.b32.end [7/7] (short) (narrow) %v3446_v50, 8 }
 0x21c   :  { %v4794_v45 = vpop.permute.xlu0 %4793 }
 0x21d   :  { %v4796_v40 = vunpack.i.h.bf16 %v4794_v45  ;;  %v4795_v44 = vunpack.i.l.bf16 %v4794_v45 }
 0x21f   :  { %v4754_v39 = vpack.c.bf16 %v4796_v40, %v4795_v44 }
 0x221   :  { %4755 = vmatpush3.bf16.msra.mxu0 %v4754_v39 }
 0x222   :  { %4756 = vmatprep.subr.bf16.mxu0 %v6428_v59 }
 0x226   :  { %v4799_v15 = vpop.permute.xlu0 %4798 }
 0x227   :  { %v4801_v1 = vunpack.i.h.bf16 %v4799_v15  ;;  %v4800_v51 = vunpack.i.l.bf16 %v4799_v15 }
 0x229   :  { %v4757_v38 = vpack.c.bf16 %v4801_v1, %v4800_v51 }
 0x22b   :  { %4758 = vmatpush3.bf16.msra.mxu0 %v4757_v38 }
 0x22c   :  { %4759 = vmatprep.subr.bf16.mxu0 %v6428_v59 }
 0x22e   :  { %v4804_v22 = vpop.permute.xlu1 %4803 }
 0x22f   :  { %v4806_v49 = vunpack.i.h.bf16 %v4804_v22  ;;  %v4805_v9 = vunpack.i.l.bf16 %v4804_v22 }
 0x231   :  { %v4760_v3 = vpack.c.bf16 %v4806_v49, %v4805_v9 }
 0x233   :  { %4761 = vmatpush3.bf16.msra.mxu0 %v4760_v3 }
 0x234   :  { %4762 = vmatprep.subr.bf16.mxu0 %v6428_v59  ;;  %v4809_v37 = vpop.permute.xlu1 %4808 }
 0x235   :  { %v4811_v35 = vunpack.i.h.bf16 %v4809_v37  ;;  %v4810_v18 = vunpack.i.l.bf16 %v4809_v37 }
 0x237   :  { %v4763_v11 = vpack.c.bf16 %v4811_v35, %v4810_v18 }
 0x239   :  { %4764 = vmatpush3.bf16.msra.mxu0 %v4763_v11 }
 0x23a   :  { %4765 = vmatprep.subr.bf16.mxu0 %v6428_v59 }
 0x243   :  { %v4814_v10 = vpop.permute.xlu0 %4813 }
 0x244   :  { %v4816_v17 = vunpack.i.h.bf16 %v4814_v10  ;;  %v4815_v25 = vunpack.i.l.bf16 %v4814_v10 }
 0x246   :  { %v4766_v31 = vpack.c.bf16 %v4816_v17, %v4815_v25 }
 0x248   :  { %v4819_v57 = vpop.permute.xlu1 %4818  ;;  %4767 = vmatpush3.bf16.msra.mxu0 %v4766_v31 }
 0x249   :  { %v4821_v24 = vunpack.i.h.bf16 %v4819_v57  ;;  %v4820_v21 = vunpack.i.l.bf16 %v4819_v57  ;;  %4768 = vmatprep.subr.bf16.mxu0 %v6428_v59  ;;  %v2436_v30 = vpop.permute.xlu0 %2435 }
 0x24b   :  { %v4769_v52 = vpack.c.bf16 %v4821_v24, %v4820_v21 }
 0x24d   :  { %4770 = vmatpush3.bf16.msra.mxu0 %v4769_v52 }
 0x24e   :  { %4731 = vmatprep.subr.mxu0 %v5018_v0 }
 0x251   :  { %4732 = vmatpush3.msk.msra.mxu0 %vm2453_vm2, %v2436_v30 }
 0x252   :  { %4734 = vmatmul.mubr.msk.f32.vlgmr.msra.gmra.mrb[112].mxu0 %vm2449_vm3, %v2396_v53 }
 0x276   :  { %v3817_v56 = vpop.trf.xlu0 }
 0x280   :  { %v3785_v27 = vpop.trf.xlu1 }
 0x281   :  { %4750 = vmatprep.mubr.msk.f32.mxu1 %vm3842_vm4, %v3785_v27 }
 0x282   :  { %4751 = vmatmul.mubr.msk.f32.vlgmr.msra.gmra.mrb[112].mxu1 %vm3842_vm4, %v3817_v56 }
 0x325   :  { %v2522_v42 = vpop.f32.mrb[112].mxu0 }
 0x326   :  { %v2523_v5 = vadd.f32 %v2522_v42, %v2397_v54  ;;  %v4735_v32 = vpop.f32.mrb[113].mxu0 }
 0x328   :  { %v2526_v43 = vmax.f32 %v2523_v5, 0.0 }
 0x32a   :  { %2528 = vst.msk [vmem:[#allocation4] sm:$0x3] %vm2527_vm5, %v2526_v43 }
 0x32b   :  { %4977 = shalt.err (!%p4974_p4)
}
 0x32c   :  { %s4978_s4 = scalar_lea.hbm %s6416_s7, 32 }
 0x32d   :  { %p4979_p5 = scmp.ne.s32.totalorder %s6416_s7, %s4978_s4  ;;  %p4982_p6 = scmp.lt.u32.totalorder %s4978_s4, %s6416_s7 }
 0x32f   :  { %p4984_p7 = pnand %p4982_p6, %p4979_p5 }
 0x331   :  { %4987 = shalt.err (!%p4984_p7)
}
 0x332   :  { %3954 = dma.vmem_to_hbm [thread:$0]  %s3952_s20, 32, %s6416_s7, [#allocation5]   ;;  %v3841_v46 = vld [vmem:[%s6412_s3 + $0x8] sm:$0xff]  ;;  %v3840_v19 = vld [vmem:[%s6412_s3] sm:$0xff]  ;;  %vm3930_vm6 = vcmask 261120  }
 0x333   :  { %s5020_s8 = smov [#allocation2]  }
 0x334   :  { %s3938_s9 = sshll.u32 %s5020_s8, 4  ;;  %s3939_s9 = int_to_ptr.vmem [resolvable:$true] %s3938_s9 }
 0x335   :  { %s4988_s7 = scalar_lea.vmem %s3939_s9, 256  ;;  %p4993_p9 = scmp.lt.s32.totalorder %s3939_s9, %s3939_s9 }
 0x336   :  { %p4989_p8 = scmp.ne.s32.totalorder %s3939_s9, %s4988_s7  ;;  %p4994_p10 = scmp.lt.s32.totalorder %s4988_s7, %s4988_s7 }
 0x338   :  { %p4995_p11 = por %p4994_p10, %p4993_p9 }
 0x33a   :  { %p4996_p12 = pnand %p4995_p11, %p4989_p8 }
 0x355   :  { %v4752_v0 = vpop.f32.mrb[112].mxu1 }
 0x356   :  { %v3925_v34 = vadd.f32 %v4752_v0, %v3841_v46  ;;  %v3919_v8 = vpop.f32.mrb[113].mxu1 }
 0x357   :  { %v3920_v13 = vadd.f32 %v3919_v8, %v3840_v19 }
 0x358   :  { %v3929_v36 = vmax.f32 %v3925_v34, 0.0 }
 0x359   :  { %v3928_v48 = vmax.f32 %v3920_v13, 0.0 }
 0x35a   :  { %3932 = vst.msk [vmem:[#allocation2 + $0x8] sm:$0xff] %vm3930_vm6, %v3929_v36 }
 0x35b   :  { %3931 = vst.msk [vmem:[#allocation2] sm:$0xff] %vm3930_vm6, %v3928_v48 }
 0x35c   :  { %4999 = shalt.err (!%p4996_p12)
}
 0x35d   :  { %s5000_s11 = scalar_lea.hbm %s6415_s6, 256 }
 0x35e   :  { %p5001_p13 = scmp.ne.s32.totalorder %s6415_s6, %s5000_s11  ;;  %p5004_p0 = scmp.lt.u32.totalorder %s5000_s11, %s6415_s6 }
 0x360   :  { %p5006_p1 = pnand %p5004_p0, %p5001_p13 }
 0x362   :  { %5009 = shalt.err (!%p5006_p1)
}
 0x363   :  { %s5021_s2 = smov 128   ;;  %s5022_s16 = smov 8  }
 0x364   :  { %3944 = dma.vmem_to_hbm [thread:$0]  %s3939_s9, 256, %s6415_s6, [#allocation3], %s5021_s2, %s5021_s2, %s5022_s16  }
 0x365   :  { %5010 = dma.done.wait [#allocation3], 256  }
 0x366   :  { %5011 = vsyncadd [#allocation3], 4294967040 }
 0x367   :  { %5012 = dma.done.wait [#allocation5], 32  }
 0x368   :  { %5013 = vsyncadd [#allocation5], 4294967264 }
 0x369   :  { %3961 = vsyncpa [#allocation3], 1 }
 0x36a   :  { %3962 = vsyncpa [#allocation5], 1 }

</bundles_post_ra>
